<compile_context>
chip_gen: v6e
topology: v6e:2x2x1
jax: 0.10.0
libtpu: 0.0.40
codegen_flags: <defaults>
</compile_context>

<pallas_src>
import functools
import math

import jax
import jax.numpy as jnp
from jax.experimental import pallas as pl
from jax.experimental.pallas import tpu as pltpu


# ----------------------------------------------------------------------------- kernel
def _grnn_db_kernel(x_ref, s_ref, z0_ref,
                    wh_ref, wc_ref, w1_ref, w2_ref, bias_ref,
                    y_ref,
                    carry_scr, zprev_scr, yg_scr,
                    *, K0, K1):
    f32 = jnp.float32
    T_blk, F_pad, N = x_ref.shape[1], x_ref.shape[2], x_ref.shape[3]
    H = zprev_scr.shape[0]
    G = wc_ref.shape[0]
    R0 = w1_ref.shape[0]
    R1 = w2_ref.shape[0]
    L = yg_scr.shape[1]                       # = T_blk * N  (lane-packed)
    cdt = wh_ref.dtype                        # compute dtype for MXU operands

    DKX = (K0 - 1) * F_pad                    # diffused x-tap rows
    DKZ = (K0 - 1) * H                        # diffused z-tap rows
    DKO = (K1 - 1) * H                        # diffused o-tap rows
    D_keep = DKX + DKZ + DKO                  # only taps that are reused get diffused

    tb = pl.program_id(1)

    @pl.when(tb == 0)
    def _init():
        carry_scr[...] = jnp.zeros_like(carry_scr)
        zprev_scr[...] = z0_ref[0].astype(zprev_scr.dtype)

    # ---- step-invariant loads / broadcasts, hoisted out of the time loop ----
    w_h = wh_ref[...]                                        # (H, K0*(F_pad+H))
    w_c = wc_ref[...]                                        # (G, K1*H)
    bias_all = bias_ref[...]                                 # (H+G+R0+R1, 1) f32
    bias_h = jnp.broadcast_to(bias_all[0:H], (H, N))

    # recurrent state lives in registers for the whole time block
    carry = carry_scr[...]                                   # (>=D_keep, N) cdt
    z_prev = zprev_scr[...]                                  # (H, N) f32

    # Fully unrolled time loop (T_blk is small/static). At production H / T_blk
    # check the bundle dump for vreg spills and reduce t_blk if needed.
    for ti in range(T_blk):
        S_t = s_ref[0, ti]                                   # (N, N) cdt
        x_t = x_ref[0, ti].astype(f32)                       # (F_pad, N)

        # ONE diffusion matmul over exactly the taps that are reused next step.
        if D_keep > 0:
            diff = jnp.dot(carry[0:D_keep], S_t, preferred_element_type=f32)
            off = 0
            if K0 > 1:
                diff_x = diff[off:off + DKX]; off += DKX     # x taps 1..K0-1
                diff_z = diff[off:off + DKZ]; off += DKZ     # z taps 1..K0-1
            if K1 > 1:
                diff_o = diff[off:off + DKO]                 # o taps 1..K1-1

        # hidden state: one fused GEMM over all (a_k, b_k) taps, sigma = tanh.
        # Operand is built in registers (8-row aligned pieces -> vreg copies).
        h_parts = [x_t]
        if K0 > 1:
            h_parts.append(diff_x)
        h_parts.append(z_prev)
        if K0 > 1:
            h_parts.append(diff_z)
        operand_h = jnp.concatenate(h_parts, axis=0)         # (K0*(F_pad+H), N)
        z_t = jnp.tanh(jnp.dot(w_h, operand_h.astype(cdt),
                               preferred_element_type=f32) + bias_h)

        # output filter pre-activation (bias/tanh/readout deferred to post-loop)
        o_parts = [z_t]
        if K1 > 1:
            o_parts.append(diff_o)
        operand_o = jnp.concatenate(o_parts, axis=0)         # (K1*H, N)
        pre_t = jnp.dot(w_c, operand_o.astype(cdt),
                        preferred_element_type=f32)          # (G, N)
        yg_scr[:, ti * N:(ti + 1) * N] = pre_t               # lane-packed stash

        # next-step carry = taps 0..K-2 of each block (the only rows diffused)
        keep = []
        if K0 > 1:
            keep.append(x_t)
            if K0 > 2:
                keep.append(diff_x[0:(K0 - 2) * F_pad])
            keep.append(z_prev)
            if K0 > 2:
                keep.append(diff_z[0:(K0 - 2) * H])
        if K1 > 1:
            keep.append(z_t)
            if K1 > 2:
                keep.append(diff_o[0:(K1 - 2) * H])
        if keep:
            carry = jnp.concatenate(keep, axis=0).astype(carry_scr.dtype)
        z_prev = z_t

    # write the recurrent state back once per time block
    carry_scr[...] = carry
    zprev_scr[...] = z_prev

    # ---- batched readout over the whole time block (lane-dense, >=128 lanes) ----
    w1 = w1_ref[...]                                         # (R0, G)
    w2 = w2_ref[...]                                         # (R1, R0)
    bias_c = jnp.broadcast_to(bias_all[H:H + G], (G, L))
    bias_1 = jnp.broadcast_to(bias_all[H + G:H + G + R0], (R0, L))
    bias_2 = jnp.broadcast_to(bias_all[H + G + R0:], (R1, L))

    y_g = jnp.tanh(yg_scr[...] + bias_c)                     # (G, L)
    h1 = jnp.maximum(jnp.dot(w1, y_g.astype(cdt),
                             preferred_element_type=f32) + bias_1, 0.0)
    y_out = jnp.dot(w2, h1.astype(cdt),
                    preferred_element_type=f32) + bias_2      # (R1, L)
    y_ref[0, 0] = y_out.astype(y_ref.dtype)                  # single lane-dense store


# ----------------------------------------------------------------------------- wrapper
def grnn_db_forward(x, S, z0, params, *, t_blk=None, compute_dtype=jnp.float32):
    """x: (B,T,F,N), S: (B,T,E,N,N) or (B,T,N,N), z0: (B,H,N) -> y: (B,T,R_last,N).

    compute_dtype: MXU operand dtype (use jnp.bfloat16 on v6e/v7x for production
    sizes; accumulation is always f32). Default f32 keeps exact parity with the
    f32 reference at tight tolerances.
    """
    B, T, F_in, N = x.shape
    if S.ndim == 5:
        # TODO(synk): dimEdgeFeatures > 1 is not implemented (E == 1 assumed).
        assert S.shape[2] == 1
        S = S[:, :, 0]
    a, b, xb, zb, c, cb, w1, b1, w2, b2 = params
    K0, H, _ = a.shape
    K1, G, _ = c.shape
    R0 = w1.shape[0]
    R1 = w2.shape[0]

    # ---- sublane-align the x-tap block: pad F up to a multiple of 8 ----
    F_pad = -(-F_in // 8) * 8
    if F_pad != F_in:
        x = jnp.pad(x, ((0, 0), (0, 0), (0, F_pad - F_in), (0, 0)))
        a = jnp.pad(a, ((0, 0), (0, 0), (0, F_pad - F_in)))

    # ---- step-invariant parameter fusion, hoisted out of the kernel ----
    w_h = jnp.concatenate(
        [jnp.transpose(a, (1, 0, 2)).reshape(H, K0 * F_pad),   # a_0 .. a_{K0-1}
         jnp.transpose(b, (1, 0, 2)).reshape(H, K0 * H)],      # b_0 .. b_{K0-1}
        axis=1)
    w_c = jnp.transpose(c, (1, 0, 2)).reshape(G, K1 * H)       # c_0 .. c_{K1-1}
    bias_all = jnp.concatenate([(xb + zb), cb, b1, b2], axis=0).astype(jnp.float32)

    # ---- time blocking; pad T when it has no usable divisor (e.g. prime T) ----
    if t_blk is None:
        t_blk = max(d for d in range(1, min(T, 16) + 1) if T % d == 0)
        if t_blk < min(T, 8):
            t_blk = min(T, 8)
    T_pad = -(-T // t_blk) * t_blk
    if T_pad != T:      # padded tail steps are computed and discarded (causal)
        x = jnp.pad(x, ((0, 0), (0, T_pad - T), (0, 0), (0, 0)))
        S = jnp.pad(S, ((0, 0), (0, T_pad - T), (0, 0), (0, 0)))
    n_tb = T_pad // t_blk
    L = t_blk * N

    cdt = compute_dtype
    x = x.astype(cdt)
    S = S.astype(cdt)
    w_h = w_h.astype(cdt)
    w_c = w_c.astype(cdt)
    w1c = w1.astype(cdt)
    w2c = w2.astype(cdt)
    z0 = z0.astype(jnp.float32)

    D_keep = (K0 - 1) * F_pad + (K0 - 1) * H + (K1 - 1) * H
    D_alloc = max(D_keep, 8)                 # dummy scratch if K0 == K1 == 1

    # ---- VMEM budget derived from the actual block sizes (v7x-safe clamp) ----
    itm = jnp.dtype(cdt).itemsize
    blk_bytes = t_blk * N * (F_pad + N) * itm + R1 * L * 4
    param_bytes = (w_h.size + w_c.size + w1.size + w2.size) * itm \
        + bias_all.size * 4 + H * N * 4
    scratch_bytes = (D_alloc * N + H * N) * 4 + G * L * 4
    vmem_limit = int(min(48 * 2 ** 20,
                         max(32 * 2 ** 20,
                             4 * blk_bytes + 2 * param_bytes + scratch_bytes
                             + 4 * 2 ** 20)))

    kernel = functools.partial(_grnn_db_kernel, K0=K0, K1=K1)

    grid_spec = pltpu.PrefetchScalarGridSpec(
        num_scalar_prefetch=0,
        grid=(B, n_tb),                       # batch parallel, time-blocks serial
        in_specs=[
            pl.BlockSpec((1, t_blk, F_pad, N), lambda bi, tb: (bi, tb, 0, 0)),  # x
            pl.BlockSpec((1, t_blk, N, N), lambda bi, tb: (bi, tb, 0, 0)),      # S
            pl.BlockSpec((1, H, N), lambda bi, tb: (bi, 0, 0)),                 # z0
            pl.BlockSpec((H, K0 * (F_pad + H)), lambda bi, tb: (0, 0)),         # W_h
            pl.BlockSpec((G, K1 * H), lambda bi, tb: (0, 0)),                   # W_c
            pl.BlockSpec((R0, G), lambda bi, tb: (0, 0)),                       # W1
            pl.BlockSpec((R1, R0), lambda bi, tb: (0, 0)),                      # W2
            pl.BlockSpec((H + G + R0 + R1, 1), lambda bi, tb: (0, 0)),          # biases
        ],
        out_specs=pl.BlockSpec((1, 1, R1, L), lambda bi, tb: (bi, tb, 0, 0)),
        scratch_shapes=[
            pltpu.VMEM((D_alloc, N), cdt),        # diffused-tap carry (x|z|o keep rows)
            pltpu.VMEM((H, N), jnp.float32),      # z_{t-1}
            pltpu.VMEM((G, L), jnp.float32),      # lane-packed output-filter preacts
        ],
    )
    y_flat = pl.pallas_call(
        kernel,
        out_shape=jax.ShapeDtypeStruct((B, n_tb, R1, L), jnp.float32),
        grid_spec=grid_spec,
        compiler_params=pltpu.CompilerParams(
            dimension_semantics=("parallel", "arbitrary"),
            vmem_limit_bytes=vmem_limit,
        ),
    )(x, S, z0, w_h, w_c, w1c, w2c, bias_all)

    # (B, n_tb, R1, t_blk*N) -> (B, T, R1, N)
    y = y_flat.reshape(B, n_tb, R1, t_blk, N).transpose(0, 1, 3, 2, 4)
    y = y.reshape(B, T_pad, R1, N)[:, :T]
    return y


# ----------------------------------------------------------------------------- pure-JAX reference
def reference_forward(x, S, z0, params):
    if S.ndim == 5:
        S = S[:, :, 0]
    a, b, xb, zb, c, cb, w1, b1, w2, b2 = params
    B, T, F_in, N = x.shape
    K0, H, _ = a.shape
    K1 = c.shape[0]
    xbuf = jnp.zeros((K0, B, F_in, N), jnp.float32)
    zbuf = jnp.zeros((K0, B, H, N), jnp.float32)
    obuf = jnp.zeros((K1, B, H, N), jnp.float32)
    zprev = z0
    ys = []
    for t in range(T):
        St = S[:, t]
        xbuf = jnp.stack([x[:, t]] + [jnp.einsum('bfm,bmn->bfn', xbuf[k - 1], St)
                                      for k in range(1, K0)])
        zbuf = jnp.stack([zprev] + [jnp.einsum('bhm,bmn->bhn', zbuf[k - 1], St)
                                    for k in range(1, K0)])
        acc = (jnp.einsum('khf,kbfn->bhn', a, xbuf)
               + jnp.einsum('khj,kbjn->bhn', b, zbuf) + xb + zb)
        zt = jnp.tanh(acc)
        zprev = zt
        obuf = jnp.stack([zt] + [jnp.einsum('bhm,bmn->bhn', obuf[k - 1], St)
                                 for k in range(1, K1)])
        yg = jnp.tanh(jnp.einsum('kgh,kbhn->bgn', c, obuf) + cb)
        h1 = jax.nn.relu(jnp.einsum('rg,bgn->brn', w1, yg) + b1)
        ys.append(jnp.einsum('qr,brn->bqn', w2, h1) + b2)
    return jnp.stack(ys, axis=1)


# ----------------------------------------------------------------------------- params
def init_params(key, F_in, H, G, K0, K1, dim_readout):
    R0, R1 = dim_readout
    ks = jax.random.split(key, 10)

    def u(k, shape, scale):
        return jax.random.uniform(k, shape, jnp.float32, minval=-scale, maxval=scale)

    s_hid = 1.0 / math.sqrt(F_in * K0)
    s_out = 1.0 / math.sqrt(H * K1)
    a = u(ks[0], (K0, H, F_in), s_hid)       # signal-to-hidden taps
    b = u(ks[1], (K0, H, H), s_hid)          # hidden-to-hidden taps
    xb = u(ks[2], (H, 1), s_hid)             # hidden-eq bias (input part)
    zb = u(ks[3], (H, 1), s_hid)             # hidden-eq bias (hidden part)
    c = u(ks[4], (K1, G, H), s_out)          # output filter taps
    cb = u(ks[5], (G, 1), s_out)             # output filter bias
    w1 = u(ks[6], (R0, G), 1.0 / math.sqrt(G))
    b1 = u(ks[7], (R0, 1), 1.0 / math.sqrt(G))
    w2 = u(ks[8], (R1, R0), 1.0 / math.sqrt(R0))
    b2 = u(ks[9], (R1, 1), 1.0 / math.sqrt(R0))
    return (a, b, xb, zb, c, cb, w1, b1, w2, b2)


# ----------------------------------------------------------------------------- main
if __name__ == "__main__":
    B, T, N = 2, 8, 16
    F_in, H, G = 3, 8, 4
    nFilterTaps = [3, 3]
    dimReadout = [8, 2]
    E = 1

    key = jax.random.PRNGKey(0)
    k_x, k_s, k_z, k_p = jax.random.split(key, 4)

    x = jax.random.normal(k_x, (B, T, F_in, N), jnp.float32)
    A = jax.random.uniform(k_s, (B, T, E, N, N), jnp.float32)
    S = 0.5 * (A + jnp.swapaxes(A, -1, -2)) / N          # symmetric, normalized GSO
    z0 = jax.random.normal(k_z, (B, H, N), jnp.float32)  # random hidden init (torch.randn)
    params = init_params(k_p, F_in, H, G, nFilterTaps[0], nFilterTaps[1], dimReadout)

    y = grnn_db_forward(x, S, z0, params)
    y = jax.block_until_ready(y)

    assert y.shape == (B, T, dimReadout[-1], N)
    y_ref = reference_forward(x, S, z0, params)
    assert bool(jnp.allclose(y, y_ref, atol=1e-3, rtol=1e-3)), "kernel/reference mismatch"

    print("KERNEL_OK")
</pallas_src>

<mosaic_0001>
module attributes {stable_mosaic.version = 11 : i64} {
  func.func @_grnn_db_kernel(%arg0: i32, %arg1: i32, %arg2: memref<1x8x8x16xf32, #tpu.memory_space<vmem>>, %arg3: memref<1x8x16x16xf32, #tpu.memory_space<vmem>>, %arg4: memref<1x8x16xf32, #tpu.memory_space<vmem>>, %arg5: memref<8x48xf32, #tpu.memory_space<vmem>>, %arg6: memref<4x24xf32, #tpu.memory_space<vmem>>, %arg7: memref<8x4xf32, #tpu.memory_space<vmem>>, %arg8: memref<2x8xf32, #tpu.memory_space<vmem>>, %arg9: memref<22x1xf32, #tpu.memory_space<vmem>>, %arg10: memref<1x1x2x128xf32, #tpu.memory_space<vmem>>, %arg11: memref<48x16xf32, #tpu.memory_space<vmem>>, %arg12: memref<8x16xf32, #tpu.memory_space<vmem>>, %arg13: memref<4x128xf32, #tpu.memory_space<vmem>>) attributes {dimension_semantics = [#tpu.dimension_semantics<parallel>, #tpu.dimension_semantics<arbitrary>], iteration_bounds = array<i64: 2, 1>, scalar_prefetch = 0 : i64, scratch_operands = 3 : i64, tpu.core_type = #tpu.core_type<tc>, window_params = [{transform_indices = @transform_0, window_bounds = array<i64: 1, 8, 8, 16>}, {transform_indices = @transform_1, window_bounds = array<i64: 1, 8, 16, 16>}, {transform_indices = @transform_2, window_bounds = array<i64: 1, 8, 16>}, {pipeline_mode = #tpu.pipeline_mode<synchronous>, transform_indices = @transform_3, window_bounds = array<i64: 8, 48>}, {pipeline_mode = #tpu.pipeline_mode<synchronous>, transform_indices = @transform_4, window_bounds = array<i64: 4, 24>}, {pipeline_mode = #tpu.pipeline_mode<synchronous>, transform_indices = @transform_5, window_bounds = array<i64: 8, 4>}, {pipeline_mode = #tpu.pipeline_mode<synchronous>, transform_indices = @transform_6, window_bounds = array<i64: 2, 8>}, {pipeline_mode = #tpu.pipeline_mode<synchronous>, transform_indices = @transform_7, window_bounds = array<i64: 22, 1>}, {transform_indices = @transform_8, window_bounds = array<i64: 1, 1, 2, 128>}]} {
    %c0_i32 = arith.constant 0 : i32
    %0 = arith.cmpi eq, %arg1, %c0_i32 : i32
    %1 = arith.extui %0 : i1 to i32
    %c0_i32_0 = arith.constant 0 : i32
    %2 = arith.cmpi ne, %1, %c0_i32_0 : i32
    scf.if %2 {
      %cst_116 = arith.constant 0.000000e+00 : f32
      %188 = vector.broadcast %cst_116 : f32 to vector<48x16xf32>
      %c0_117 = arith.constant 0 : index
      %c0_118 = arith.constant 0 : index
      %189 = vector.load %arg11[%c0_117, %c0_118] : memref<48x16xf32, #tpu.memory_space<vmem>>, vector<48x16xf32>
      tpu.vector_store %arg11[%c0_117, %c0_118], %188 {strides = array<i32>} : memref<48x16xf32, #tpu.memory_space<vmem>>, vector<48x16xf32>,
      %c0_119 = arith.constant 0 : index
      %c0_120 = arith.constant 0 : index
      %c0_121 = arith.constant 0 : index
      %190 = vector.load %arg4[%c0_119, %c0_120, %c0_121] : memref<1x8x16xf32, #tpu.memory_space<vmem>>, vector<1x8x16xf32>
      %191 = vector.shape_cast %190 : vector<1x8x16xf32> to vector<8x16xf32>
      %c0_122 = arith.constant 0 : index
      %c0_123 = arith.constant 0 : index
      %192 = vector.load %arg12[%c0_122, %c0_123] : memref<8x16xf32, #tpu.memory_space<vmem>>, vector<8x16xf32>
      tpu.vector_store %arg12[%c0_122, %c0_123], %191 {strides = array<i32>} : memref<8x16xf32, #tpu.memory_space<vmem>>, vector<8x16xf32>,
    } else {
    }
    %c0 = arith.constant 0 : index
    %c0_1 = arith.constant 0 : index
    %3 = vector.load %arg5[%c0, %c0_1] : memref<8x48xf32, #tpu.memory_space<vmem>>, vector<8x48xf32>
    %c0_2 = arith.constant 0 : index
    %c0_3 = arith.constant 0 : index
    %4 = vector.load %arg6[%c0_2, %c0_3] : memref<4x24xf32, #tpu.memory_space<vmem>>, vector<4x24xf32>
    %c0_4 = arith.constant 0 : index
    %c0_5 = arith.constant 0 : index
    %5 = vector.load %arg9[%c0_4, %c0_5] : memref<22x1xf32, #tpu.memory_space<vmem>>, vector<22x1xf32>
    %6 = vector.extract_strided_slice %5 {offsets = [0, 0], sizes = [8, 1], strides = [1, 1]} : vector<22x1xf32> to vector<8x1xf32>
    %7 = vector.shape_cast %6 : vector<8x1xf32> to vector<8x1xf32>
    %8 = vector.broadcast %7 : vector<8x1xf32> to vector<8x16xf32>
    %c0_6 = arith.constant 0 : index
    %c0_7 = arith.constant 0 : index
    %9 = vector.load %arg11[%c0_6, %c0_7] : memref<48x16xf32, #tpu.memory_space<vmem>>, vector<48x16xf32>
    %c0_8 = arith.constant 0 : index
    %c0_9 = arith.constant 0 : index
    %10 = vector.load %arg12[%c0_8, %c0_9] : memref<8x16xf32, #tpu.memory_space<vmem>>, vector<8x16xf32>
    %c0_10 = arith.constant 0 : index
    %c0_11 = arith.constant 0 : index
    %c0_12 = arith.constant 0 : index
    %c0_13 = arith.constant 0 : index
    %11 = vector.load %arg3[%c0_10, %c0_11, %c0_12, %c0_13] : memref<1x8x16x16xf32, #tpu.memory_space<vmem>>, vector<1x1x16x16xf32>
    %12 = vector.shape_cast %11 : vector<1x1x16x16xf32> to vector<16x16xf32>
    %c0_14 = arith.constant 0 : index
    %c0_15 = arith.constant 0 : index
    %c0_16 = arith.constant 0 : index
    %c0_17 = arith.constant 0 : index
    %13 = vector.load %arg2[%c0_14, %c0_15, %c0_16, %c0_17] : memref<1x8x8x16xf32, #tpu.memory_space<vmem>>, vector<1x1x8x16xf32>
    %14 = vector.shape_cast %13 : vector<1x1x8x16xf32> to vector<8x16xf32>
    %cst = arith.constant dense<0.000000e+00> : vector<48x16xf32>
    %15 = tpu.matmul %9, %12, %cst {dimension_numbers = #tpu.dot_dimension_numbers<[1], [0], [0], [1], [0, 0, 1, 1], [], []>} : vector<48x16xf32>, vector<16x16xf32>, vector<48x16xf32> -> vector<48x16xf32>
    %16 = vector.extract_strided_slice %15 {offsets = [0, 0], sizes = [16, 16], strides = [1, 1]} : vector<48x16xf32> to vector<16x16xf32>
    %17 = vector.extract_strided_slice %15 {offsets = [16, 0], sizes = [16, 16], strides = [1, 1]} : vector<48x16xf32> to vector<16x16xf32>
    %18 = vector.extract_strided_slice %15 {offsets = [32, 0], sizes = [16, 16], strides = [1, 1]} : vector<48x16xf32> to vector<16x16xf32>
    %19 = tpu.concatenate %14, %16, %10, %17 in 0 : vector<8x16xf32>, vector<16x16xf32>, vector<8x16xf32>, vector<16x16xf32> -> vector<48x16xf32>
    %cst_18 = arith.constant dense<0.000000e+00> : vector<8x16xf32>
    %20 = tpu.matmul %3, %19, %cst_18 {dimension_numbers = #tpu.dot_dimension_numbers<[1], [0], [0], [1], [0, 0, 1, 1], [], []>} : vector<8x48xf32>, vector<48x16xf32>, vector<8x16xf32> -> vector<8x16xf32>
    %21 = arith.addf %20, %8 : vector<8x16xf32>
    %22 = math.tanh %21 : vector<8x16xf32>
    %23 = tpu.concatenate %22, %18 in 0 : vector<8x16xf32>, vector<16x16xf32> -> vector<24x16xf32>
    %cst_19 = arith.constant dense<0.000000e+00> : vector<4x16xf32>
    %24 = tpu.matmul %4, %23, %cst_19 {dimension_numbers = #tpu.dot_dimension_numbers<[1], [0], [0], [1], [0, 0, 1, 1], [], []>} : vector<4x24xf32>, vector<24x16xf32>, vector<4x16xf32> -> vector<4x16xf32>
    %c0_20 = arith.constant 0 : index
    %c0_21 = arith.constant 0 : index
    %25 = vector.load %arg13[%c0_20, %c0_21] : memref<4x128xf32, #tpu.memory_space<vmem>>, vector<4x16xf32>
    tpu.vector_store %arg13[%c0_20, %c0_21], %24 {strides = array<i32>} : memref<4x128xf32, #tpu.memory_space<vmem>>, vector<4x16xf32>,
    %26 = vector.extract_strided_slice %16 {offsets = [0, 0], sizes = [8, 16], strides = [1, 1]} : vector<16x16xf32> to vector<8x16xf32>
    %27 = vector.extract_strided_slice %17 {offsets = [0, 0], sizes = [8, 16], strides = [1, 1]} : vector<16x16xf32> to vector<8x16xf32>
    %28 = vector.extract_strided_slice %18 {offsets = [0, 0], sizes = [8, 16], strides = [1, 1]} : vector<16x16xf32> to vector<8x16xf32>
    %29 = tpu.concatenate %14, %26, %10, %27, %22, %28 in 0 : vector<8x16xf32>, vector<8x16xf32>, vector<8x16xf32>, vector<8x16xf32>, vector<8x16xf32>, vector<8x16xf32> -> vector<48x16xf32>
    %c0_22 = arith.constant 0 : index
    %c1 = arith.constant 1 : index
    %c0_23 = arith.constant 0 : index
    %c0_24 = arith.constant 0 : index
    %30 = vector.load %arg3[%c0_22, %c1, %c0_23, %c0_24] : memref<1x8x16x16xf32, #tpu.memory_space<vmem>>, vector<1x1x16x16xf32>
    %31 = vector.shape_cast %30 : vector<1x1x16x16xf32> to vector<16x16xf32>
    %c0_25 = arith.constant 0 : index
    %c1_26 = arith.constant 1 : index
    %c0_27 = arith.constant 0 : index
    %c0_28 = arith.constant 0 : index
    %32 = vector.load %arg2[%c0_25, %c1_26, %c0_27, %c0_28] : memref<1x8x8x16xf32, #tpu.memory_space<vmem>>, vector<1x1x8x16xf32>
    %33 = vector.shape_cast %32 : vector<1x1x8x16xf32> to vector<8x16xf32>
    %cst_29 = arith.constant dense<0.000000e+00> : vector<48x16xf32>
    %34 = tpu.matmul %29, %31, %cst_29 {dimension_numbers = #tpu.dot_dimension_numbers<[1], [0], [0], [1], [0, 0, 1, 1], [], []>} : vector<48x16xf32>, vector<16x16xf32>, vector<48x16xf32> -> vector<48x16xf32>
    %35 = vector.extract_strided_slice %34 {offsets = [0, 0], sizes = [16, 16], strides = [1, 1]} : vector<48x16xf32> to vector<16x16xf32>
    %36 = vector.extract_strided_slice %34 {offsets = [16, 0], sizes = [16, 16], strides = [1, 1]} : vector<48x16xf32> to vector<16x16xf32>
    %37 = vector.extract_strided_slice %34 {offsets = [32, 0], sizes = [16, 16], strides = [1, 1]} : vector<48x16xf32> to vector<16x16xf32>
    %38 = tpu.concatenate %33, %35, %22, %36 in 0 : vector<8x16xf32>, vector<16x16xf32>, vector<8x16xf32>, vector<16x16xf32> -> vector<48x16xf32>
    %cst_30 = arith.constant dense<0.000000e+00> : vector<8x16xf32>
    %39 = tpu.matmul %3, %38, %cst_30 {dimension_numbers = #tpu.dot_dimension_numbers<[1], [0], [0], [1], [0, 0, 1, 1], [], []>} : vector<8x48xf32>, vector<48x16xf32>, vector<8x16xf32> -> vector<8x16xf32>
    %40 = arith.addf %39, %8 : vector<8x16xf32>
    %41 = math.tanh %40 : vector<8x16xf32>
    %42 = tpu.concatenate %41, %37 in 0 : vector<8x16xf32>, vector<16x16xf32> -> vector<24x16xf32>
    %cst_31 = arith.constant dense<0.000000e+00> : vector<4x16xf32>
    %43 = tpu.matmul %4, %42, %cst_31 {dimension_numbers = #tpu.dot_dimension_numbers<[1], [0], [0], [1], [0, 0, 1, 1], [], []>} : vector<4x24xf32>, vector<24x16xf32>, vector<4x16xf32> -> vector<4x16xf32>
    %c0_32 = arith.constant 0 : index
    %c16 = arith.constant 16 : index
    %44 = vector.load %arg13[%c0_32, %c16] : memref<4x128xf32, #tpu.memory_space<vmem>>, vector<4x16xf32>
    tpu.vector_store %arg13[%c0_32, %c16], %43 {strides = array<i32>} : memref<4x128xf32, #tpu.memory_space<vmem>>, vector<4x16xf32>,
    %45 = vector.extract_strided_slice %35 {offsets = [0, 0], sizes = [8, 16], strides = [1, 1]} : vector<16x16xf32> to vector<8x16xf32>
    %46 = vector.extract_strided_slice %36 {offsets = [0, 0], sizes = [8, 16], strides = [1, 1]} : vector<16x16xf32> to vector<8x16xf32>
    %47 = vector.extract_strided_slice %37 {offsets = [0, 0], sizes = [8, 16], strides = [1, 1]} : vector<16x16xf32> to vector<8x16xf32>
    %48 = tpu.concatenate %33, %45, %22, %46, %41, %47 in 0 : vector<8x16xf32>, vector<8x16xf32>, vector<8x16xf32>, vector<8x16xf32>, vector<8x16xf32>, vector<8x16xf32> -> vector<48x16xf32>
    %c0_33 = arith.constant 0 : index
    %c2 = arith.constant 2 : index
    %c0_34 = arith.constant 0 : index
    %c0_35 = arith.constant 0 : index
    %49 = vector.load %arg3[%c0_33, %c2, %c0_34, %c0_35] : memref<1x8x16x16xf32, #tpu.memory_space<vmem>>, vector<1x1x16x16xf32>
    %50 = vector.shape_cast %49 : vector<1x1x16x16xf32> to vector<16x16xf32>
    %c0_36 = arith.constant 0 : index
    %c2_37 = arith.constant 2 : index
    %c0_38 = arith.constant 0 : index
    %c0_39 = arith.constant 0 : index
    %51 = vector.load %arg2[%c0_36, %c2_37, %c0_38, %c0_39] : memref<1x8x8x16xf32, #tpu.memory_space<vmem>>, vector<1x1x8x16xf32>
    %52 = vector.shape_cast %51 : vector<1x1x8x16xf32> to vector<8x16xf32>
    %cst_40 = arith.constant dense<0.000000e+00> : vector<48x16xf32>
    %53 = tpu.matmul %48, %50, %cst_40 {dimension_numbers = #tpu.dot_dimension_numbers<[1], [0], [0], [1], [0, 0, 1, 1], [], []>} : vector<48x16xf32>, vector<16x16xf32>, vector<48x16xf32> -> vector<48x16xf32>
    %54 = vector.extract_strided_slice %53 {offsets = [0, 0], sizes = [16, 16], strides = [1, 1]} : vector<48x16xf32> to vector<16x16xf32>
    %55 = vector.extract_strided_slice %53 {offsets = [16, 0], sizes = [16, 16], strides = [1, 1]} : vector<48x16xf32> to vector<16x16xf32>
    %56 = vector.extract_strided_slice %53 {offsets = [32, 0], sizes = [16, 16], strides = [1, 1]} : vector<48x16xf32> to vector<16x16xf32>
    %57 = tpu.concatenate %52, %54, %41, %55 in 0 : vector<8x16xf32>, vector<16x16xf32>, vector<8x16xf32>, vector<16x16xf32> -> vector<48x16xf32>
    %cst_41 = arith.constant dense<0.000000e+00> : vector<8x16xf32>
    %58 = tpu.matmul %3, %57, %cst_41 {dimension_numbers = #tpu.dot_dimension_numbers<[1], [0], [0], [1], [0, 0, 1, 1], [], []>} : vector<8x48xf32>, vector<48x16xf32>, vector<8x16xf32> -> vector<8x16xf32>
    %59 = arith.addf %58, %8 : vector<8x16xf32>
    %60 = math.tanh %59 : vector<8x16xf32>
    %61 = tpu.concatenate %60, %56 in 0 : vector<8x16xf32>, vector<16x16xf32> -> vector<24x16xf32>
    %cst_42 = arith.constant dense<0.000000e+00> : vector<4x16xf32>
    %62 = tpu.matmul %4, %61, %cst_42 {dimension_numbers = #tpu.dot_dimension_numbers<[1], [0], [0], [1], [0, 0, 1, 1], [], []>} : vector<4x24xf32>, vector<24x16xf32>, vector<4x16xf32> -> vector<4x16xf32>
    %c0_43 = arith.constant 0 : index
    %c32 = arith.constant 32 : index
    %63 = vector.load %arg13[%c0_43, %c32] : memref<4x128xf32, #tpu.memory_space<vmem>>, vector<4x16xf32>
    tpu.vector_store %arg13[%c0_43, %c32], %62 {strides = array<i32>} : memref<4x128xf32, #tpu.memory_space<vmem>>, vector<4x16xf32>,
    %64 = vector.extract_strided_slice %54 {offsets = [0, 0], sizes = [8, 16], strides = [1, 1]} : vector<16x16xf32> to vector<8x16xf32>
    %65 = vector.extract_strided_slice %55 {offsets = [0, 0], sizes = [8, 16], strides = [1, 1]} : vector<16x16xf32> to vector<8x16xf32>
    %66 = vector.extract_strided_slice %56 {offsets = [0, 0], sizes = [8, 16], strides = [1, 1]} : vector<16x16xf32> to vector<8x16xf32>
    %67 = tpu.concatenate %52, %64, %41, %65, %60, %66 in 0 : vector<8x16xf32>, vector<8x16xf32>, vector<8x16xf32>, vector<8x16xf32>, vector<8x16xf32>, vector<8x16xf32> -> vector<48x16xf32>
    %c0_44 = arith.constant 0 : index
    %c3 = arith.constant 3 : index
    %c0_45 = arith.constant 0 : index
    %c0_46 = arith.constant 0 : index
    %68 = vector.load %arg3[%c0_44, %c3, %c0_45, %c0_46] : memref<1x8x16x16xf32, #tpu.memory_space<vmem>>, vector<1x1x16x16xf32>
    %69 = vector.shape_cast %68 : vector<1x1x16x16xf32> to vector<16x16xf32>
    %c0_47 = arith.constant 0 : index
    %c3_48 = arith.constant 3 : index
    %c0_49 = arith.constant 0 : index
    %c0_50 = arith.constant 0 : index
    %70 = vector.load %arg2[%c0_47, %c3_48, %c0_49, %c0_50] : memref<1x8x8x16xf32, #tpu.memory_space<vmem>>, vector<1x1x8x16xf32>
    %71 = vector.shape_cast %70 : vector<1x1x8x16xf32> to vector<8x16xf32>
    %cst_51 = arith.constant dense<0.000000e+00> : vector<48x16xf32>
    %72 = tpu.matmul %67, %69, %cst_51 {dimension_numbers = #tpu.dot_dimension_numbers<[1], [0], [0], [1], [0, 0, 1, 1], [], []>} : vector<48x16xf32>, vector<16x16xf32>, vector<48x16xf32> -> vector<48x16xf32>
    %73 = vector.extract_strided_slice %72 {offsets = [0, 0], sizes = [16, 16], strides = [1, 1]} : vector<48x16xf32> to vector<16x16xf32>
    %74 = vector.extract_strided_slice %72 {offsets = [16, 0], sizes = [16, 16], strides = [1, 1]} : vector<48x16xf32> to vector<16x16xf32>
    %75 = vector.extract_strided_slice %72 {offsets = [32, 0], sizes = [16, 16], strides = [1, 1]} : vector<48x16xf32> to vector<16x16xf32>
    %76 = tpu.concatenate %71, %73, %60, %74 in 0 : vector<8x16xf32>, vector<16x16xf32>, vector<8x16xf32>, vector<16x16xf32> -> vector<48x16xf32>
    %cst_52 = arith.constant dense<0.000000e+00> : vector<8x16xf32>
    %77 = tpu.matmul %3, %76, %cst_52 {dimension_numbers = #tpu.dot_dimension_numbers<[1], [0], [0], [1], [0, 0, 1, 1], [], []>} : vector<8x48xf32>, vector<48x16xf32>, vector<8x16xf32> -> vector<8x16xf32>
    %78 = arith.addf %77, %8 : vector<8x16xf32>
    %79 = math.tanh %78 : vector<8x16xf32>
    %80 = tpu.concatenate %79, %75 in 0 : vector<8x16xf32>, vector<16x16xf32> -> vector<24x16xf32>
    %cst_53 = arith.constant dense<0.000000e+00> : vector<4x16xf32>
    %81 = tpu.matmul %4, %80, %cst_53 {dimension_numbers = #tpu.dot_dimension_numbers<[1], [0], [0], [1], [0, 0, 1, 1], [], []>} : vector<4x24xf32>, vector<24x16xf32>, vector<4x16xf32> -> vector<4x16xf32>
    %c0_54 = arith.constant 0 : index
    %c48 = arith.constant 48 : index
    %82 = vector.load %arg13[%c0_54, %c48] : memref<4x128xf32, #tpu.memory_space<vmem>>, vector<4x16xf32>
    tpu.vector_store %arg13[%c0_54, %c48], %81 {strides = array<i32>} : memref<4x128xf32, #tpu.memory_space<vmem>>, vector<4x16xf32>,
    %83 = vector.extract_strided_slice %73 {offsets = [0, 0], sizes = [8, 16], strides = [1, 1]} : vector<16x16xf32> to vector<8x16xf32>
    %84 = vector.extract_strided_slice %74 {offsets = [0, 0], sizes = [8, 16], strides = [1, 1]} : vector<16x16xf32> to vector<8x16xf32>
    %85 = vector.extract_strided_slice %75 {offsets = [0, 0], sizes = [8, 16], strides = [1, 1]} : vector<16x16xf32> to vector<8x16xf32>
    %86 = tpu.concatenate %71, %83, %60, %84, %79, %85 in 0 : vector<8x16xf32>, vector<8x16xf32>, vector<8x16xf32>, vector<8x16xf32>, vector<8x16xf32>, vector<8x16xf32> -> vector<48x16xf32>
    %c0_55 = arith.constant 0 : index
    %c4 = arith.constant 4 : index
    %c0_56 = arith.constant 0 : index
    %c0_57 = arith.constant 0 : index
    %87 = vector.load %arg3[%c0_55, %c4, %c0_56, %c0_57] : memref<1x8x16x16xf32, #tpu.memory_space<vmem>>, vector<1x1x16x16xf32>
    %88 = vector.shape_cast %87 : vector<1x1x16x16xf32> to vector<16x16xf32>
    %c0_58 = arith.constant 0 : index
    %c4_59 = arith.constant 4 : index
    %c0_60 = arith.constant 0 : index
    %c0_61 = arith.constant 0 : index
    %89 = vector.load %arg2[%c0_58, %c4_59, %c0_60, %c0_61] : memref<1x8x8x16xf32, #tpu.memory_space<vmem>>, vector<1x1x8x16xf32>
    %90 = vector.shape_cast %89 : vector<1x1x8x16xf32> to vector<8x16xf32>
    %cst_62 = arith.constant dense<0.000000e+00> : vector<48x16xf32>
    %91 = tpu.matmul %86, %88, %cst_62 {dimension_numbers = #tpu.dot_dimension_numbers<[1], [0], [0], [1], [0, 0, 1, 1], [], []>} : vector<48x16xf32>, vector<16x16xf32>, vector<48x16xf32> -> vector<48x16xf32>
    %92 = vector.extract_strided_slice %91 {offsets = [0, 0], sizes = [16, 16], strides = [1, 1]} : vector<48x16xf32> to vector<16x16xf32>
    %93 = vector.extract_strided_slice %91 {offsets = [16, 0], sizes = [16, 16], strides = [1, 1]} : vector<48x16xf32> to vector<16x16xf32>
    %94 = vector.extract_strided_slice %91 {offsets = [32, 0], sizes = [16, 16], strides = [1, 1]} : vector<48x16xf32> to vector<16x16xf32>
    %95 = tpu.concatenate %90, %92, %79, %93 in 0 : vector<8x16xf32>, vector<16x16xf32>, vector<8x16xf32>, vector<16x16xf32> -> vector<48x16xf32>
    %cst_63 = arith.constant dense<0.000000e+00> : vector<8x16xf32>
    %96 = tpu.matmul %3, %95, %cst_63 {dimension_numbers = #tpu.dot_dimension_numbers<[1], [0], [0], [1], [0, 0, 1, 1], [], []>} : vector<8x48xf32>, vector<48x16xf32>, vector<8x16xf32> -> vector<8x16xf32>
    %97 = arith.addf %96, %8 : vector<8x16xf32>
    %98 = math.tanh %97 : vector<8x16xf32>
    %99 = tpu.concatenate %98, %94 in 0 : vector<8x16xf32>, vector<16x16xf32> -> vector<24x16xf32>
    %cst_64 = arith.constant dense<0.000000e+00> : vector<4x16xf32>
    %100 = tpu.matmul %4, %99, %cst_64 {dimension_numbers = #tpu.dot_dimension_numbers<[1], [0], [0], [1], [0, 0, 1, 1], [], []>} : vector<4x24xf32>, vector<24x16xf32>, vector<4x16xf32> -> vector<4x16xf32>
    %c0_65 = arith.constant 0 : index
    %c64 = arith.constant 64 : index
    %101 = vector.load %arg13[%c0_65, %c64] : memref<4x128xf32, #tpu.memory_space<vmem>>, vector<4x16xf32>
    tpu.vector_store %arg13[%c0_65, %c64], %100 {strides = array<i32>} : memref<4x128xf32, #tpu.memory_space<vmem>>, vector<4x16xf32>,
    %102 = vector.extract_strided_slice %92 {offsets = [0, 0], sizes = [8, 16], strides = [1, 1]} : vector<16x16xf32> to vector<8x16xf32>
    %103 = vector.extract_strided_slice %93 {offsets = [0, 0], sizes = [8, 16], strides = [1, 1]} : vector<16x16xf32> to vector<8x16xf32>
    %104 = vector.extract_strided_slice %94 {offsets = [0, 0], sizes = [8, 16], strides = [1, 1]} : vector<16x16xf32> to vector<8x16xf32>
    %105 = tpu.concatenate %90, %102, %79, %103, %98, %104 in 0 : vector<8x16xf32>, vector<8x16xf32>, vector<8x16xf32>, vector<8x16xf32>, vector<8x16xf32>, vector<8x16xf32> -> vector<48x16xf32>
    %c0_66 = arith.constant 0 : index
    %c5 = arith.constant 5 : index
    %c0_67 = arith.constant 0 : index
    %c0_68 = arith.constant 0 : index
    %106 = vector.load %arg3[%c0_66, %c5, %c0_67, %c0_68] : memref<1x8x16x16xf32, #tpu.memory_space<vmem>>, vector<1x1x16x16xf32>
    %107 = vector.shape_cast %106 : vector<1x1x16x16xf32> to vector<16x16xf32>
    %c0_69 = arith.constant 0 : index
    %c5_70 = arith.constant 5 : index
    %c0_71 = arith.constant 0 : index
    %c0_72 = arith.constant 0 : index
    %108 = vector.load %arg2[%c0_69, %c5_70, %c0_71, %c0_72] : memref<1x8x8x16xf32, #tpu.memory_space<vmem>>, vector<1x1x8x16xf32>
    %109 = vector.shape_cast %108 : vector<1x1x8x16xf32> to vector<8x16xf32>
    %cst_73 = arith.constant dense<0.000000e+00> : vector<48x16xf32>
    %110 = tpu.matmul %105, %107, %cst_73 {dimension_numbers = #tpu.dot_dimension_numbers<[1], [0], [0], [1], [0, 0, 1, 1], [], []>} : vector<48x16xf32>, vector<16x16xf32>, vector<48x16xf32> -> vector<48x16xf32>
    %111 = vector.extract_strided_slice %110 {offsets = [0, 0], sizes = [16, 16], strides = [1, 1]} : vector<48x16xf32> to vector<16x16xf32>
    %112 = vector.extract_strided_slice %110 {offsets = [16, 0], sizes = [16, 16], strides = [1, 1]} : vector<48x16xf32> to vector<16x16xf32>
    %113 = vector.extract_strided_slice %110 {offsets = [32, 0], sizes = [16, 16], strides = [1, 1]} : vector<48x16xf32> to vector<16x16xf32>
    %114 = tpu.concatenate %109, %111, %98, %112 in 0 : vector<8x16xf32>, vector<16x16xf32>, vector<8x16xf32>, vector<16x16xf32> -> vector<48x16xf32>
    %cst_74 = arith.constant dense<0.000000e+00> : vector<8x16xf32>
    %115 = tpu.matmul %3, %114, %cst_74 {dimension_numbers = #tpu.dot_dimension_numbers<[1], [0], [0], [1], [0, 0, 1, 1], [], []>} : vector<8x48xf32>, vector<48x16xf32>, vector<8x16xf32> -> vector<8x16xf32>
    %116 = arith.addf %115, %8 : vector<8x16xf32>
    %117 = math.tanh %116 : vector<8x16xf32>
    %118 = tpu.concatenate %117, %113 in 0 : vector<8x16xf32>, vector<16x16xf32> -> vector<24x16xf32>
    %cst_75 = arith.constant dense<0.000000e+00> : vector<4x16xf32>
    %119 = tpu.matmul %4, %118, %cst_75 {dimension_numbers = #tpu.dot_dimension_numbers<[1], [0], [0], [1], [0, 0, 1, 1], [], []>} : vector<4x24xf32>, vector<24x16xf32>, vector<4x16xf32> -> vector<4x16xf32>
    %c0_76 = arith.constant 0 : index
    %c80 = arith.constant 80 : index
    %120 = vector.load %arg13[%c0_76, %c80] : memref<4x128xf32, #tpu.memory_space<vmem>>, vector<4x16xf32>
    tpu.vector_store %arg13[%c0_76, %c80], %119 {strides = array<i32>} : memref<4x128xf32, #tpu.memory_space<vmem>>, vector<4x16xf32>,
    %121 = vector.extract_strided_slice %111 {offsets = [0, 0], sizes = [8, 16], strides = [1, 1]} : vector<16x16xf32> to vector<8x16xf32>
    %122 = vector.extract_strided_slice %112 {offsets = [0, 0], sizes = [8, 16], strides = [1, 1]} : vector<16x16xf32> to vector<8x16xf32>
    %123 = vector.extract_strided_slice %113 {offsets = [0, 0], sizes = [8, 16], strides = [1, 1]} : vector<16x16xf32> to vector<8x16xf32>
    %124 = tpu.concatenate %109, %121, %98, %122, %117, %123 in 0 : vector<8x16xf32>, vector<8x16xf32>, vector<8x16xf32>, vector<8x16xf32>, vector<8x16xf32>, vector<8x16xf32> -> vector<48x16xf32>
    %c0_77 = arith.constant 0 : index
    %c6 = arith.constant 6 : index
    %c0_78 = arith.constant 0 : index
    %c0_79 = arith.constant 0 : index
    %125 = vector.load %arg3[%c0_77, %c6, %c0_78, %c0_79] : memref<1x8x16x16xf32, #tpu.memory_space<vmem>>, vector<1x1x16x16xf32>
    %126 = vector.shape_cast %125 : vector<1x1x16x16xf32> to vector<16x16xf32>
    %c0_80 = arith.constant 0 : index
    %c6_81 = arith.constant 6 : index
    %c0_82 = arith.constant 0 : index
    %c0_83 = arith.constant 0 : index
    %127 = vector.load %arg2[%c0_80, %c6_81, %c0_82, %c0_83] : memref<1x8x8x16xf32, #tpu.memory_space<vmem>>, vector<1x1x8x16xf32>
    %128 = vector.shape_cast %127 : vector<1x1x8x16xf32> to vector<8x16xf32>
    %cst_84 = arith.constant dense<0.000000e+00> : vector<48x16xf32>
    %129 = tpu.matmul %124, %126, %cst_84 {dimension_numbers = #tpu.dot_dimension_numbers<[1], [0], [0], [1], [0, 0, 1, 1], [], []>} : vector<48x16xf32>, vector<16x16xf32>, vector<48x16xf32> -> vector<48x16xf32>
    %130 = vector.extract_strided_slice %129 {offsets = [0, 0], sizes = [16, 16], strides = [1, 1]} : vector<48x16xf32> to vector<16x16xf32>
    %131 = vector.extract_strided_slice %129 {offsets = [16, 0], sizes = [16, 16], strides = [1, 1]} : vector<48x16xf32> to vector<16x16xf32>
    %132 = vector.extract_strided_slice %129 {offsets = [32, 0], sizes = [16, 16], strides = [1, 1]} : vector<48x16xf32> to vector<16x16xf32>
    %133 = tpu.concatenate %128, %130, %117, %131 in 0 : vector<8x16xf32>, vector<16x16xf32>, vector<8x16xf32>, vector<16x16xf32> -> vector<48x16xf32>
    %cst_85 = arith.constant dense<0.000000e+00> : vector<8x16xf32>
    %134 = tpu.matmul %3, %133, %cst_85 {dimension_numbers = #tpu.dot_dimension_numbers<[1], [0], [0], [1], [0, 0, 1, 1], [], []>} : vector<8x48xf32>, vector<48x16xf32>, vector<8x16xf32> -> vector<8x16xf32>
    %135 = arith.addf %134, %8 : vector<8x16xf32>
    %136 = math.tanh %135 : vector<8x16xf32>
    %137 = tpu.concatenate %136, %132 in 0 : vector<8x16xf32>, vector<16x16xf32> -> vector<24x16xf32>
    %cst_86 = arith.constant dense<0.000000e+00> : vector<4x16xf32>
    %138 = tpu.matmul %4, %137, %cst_86 {dimension_numbers = #tpu.dot_dimension_numbers<[1], [0], [0], [1], [0, 0, 1, 1], [], []>} : vector<4x24xf32>, vector<24x16xf32>, vector<4x16xf32> -> vector<4x16xf32>
    %c0_87 = arith.constant 0 : index
    %c96 = arith.constant 96 : index
    %139 = vector.load %arg13[%c0_87, %c96] : memref<4x128xf32, #tpu.memory_space<vmem>>, vector<4x16xf32>
    tpu.vector_store %arg13[%c0_87, %c96], %138 {strides = array<i32>} : memref<4x128xf32, #tpu.memory_space<vmem>>, vector<4x16xf32>,
    %140 = vector.extract_strided_slice %130 {offsets = [0, 0], sizes = [8, 16], strides = [1, 1]} : vector<16x16xf32> to vector<8x16xf32>
    %141 = vector.extract_strided_slice %131 {offsets = [0, 0], sizes = [8, 16], strides = [1, 1]} : vector<16x16xf32> to vector<8x16xf32>
    %142 = vector.extract_strided_slice %132 {offsets = [0, 0], sizes = [8, 16], strides = [1, 1]} : vector<16x16xf32> to vector<8x16xf32>
    %143 = tpu.concatenate %128, %140, %117, %141, %136, %142 in 0 : vector<8x16xf32>, vector<8x16xf32>, vector<8x16xf32>, vector<8x16xf32>, vector<8x16xf32>, vector<8x16xf32> -> vector<48x16xf32>
    %c0_88 = arith.constant 0 : index
    %c7 = arith.constant 7 : index
    %c0_89 = arith.constant 0 : index
    %c0_90 = arith.constant 0 : index
    %144 = vector.load %arg3[%c0_88, %c7, %c0_89, %c0_90] : memref<1x8x16x16xf32, #tpu.memory_space<vmem>>, vector<1x1x16x16xf32>
    %145 = vector.shape_cast %144 : vector<1x1x16x16xf32> to vector<16x16xf32>
    %c0_91 = arith.constant 0 : index
    %c7_92 = arith.constant 7 : index
    %c0_93 = arith.constant 0 : index
    %c0_94 = arith.constant 0 : index
    %146 = vector.load %arg2[%c0_91, %c7_92, %c0_93, %c0_94] : memref<1x8x8x16xf32, #tpu.memory_space<vmem>>, vector<1x1x8x16xf32>
    %147 = vector.shape_cast %146 : vector<1x1x8x16xf32> to vector<8x16xf32>
    %cst_95 = arith.constant dense<0.000000e+00> : vector<48x16xf32>
    %148 = tpu.matmul %143, %145, %cst_95 {dimension_numbers = #tpu.dot_dimension_numbers<[1], [0], [0], [1], [0, 0, 1, 1], [], []>} : vector<48x16xf32>, vector<16x16xf32>, vector<48x16xf32> -> vector<48x16xf32>
    %149 = vector.extract_strided_slice %148 {offsets = [0, 0], sizes = [16, 16], strides = [1, 1]} : vector<48x16xf32> to vector<16x16xf32>
    %150 = vector.extract_strided_slice %148 {offsets = [16, 0], sizes = [16, 16], strides = [1, 1]} : vector<48x16xf32> to vector<16x16xf32>
    %151 = vector.extract_strided_slice %148 {offsets = [32, 0], sizes = [16, 16], strides = [1, 1]} : vector<48x16xf32> to vector<16x16xf32>
    %152 = tpu.concatenate %147, %149, %136, %150 in 0 : vector<8x16xf32>, vector<16x16xf32>, vector<8x16xf32>, vector<16x16xf32> -> vector<48x16xf32>
    %cst_96 = arith.constant dense<0.000000e+00> : vector<8x16xf32>
    %153 = tpu.matmul %3, %152, %cst_96 {dimension_numbers = #tpu.dot_dimension_numbers<[1], [0], [0], [1], [0, 0, 1, 1], [], []>} : vector<8x48xf32>, vector<48x16xf32>, vector<8x16xf32> -> vector<8x16xf32>
    %154 = arith.addf %153, %8 : vector<8x16xf32>
    %155 = math.tanh %154 : vector<8x16xf32>
    %156 = tpu.concatenate %155, %151 in 0 : vector<8x16xf32>, vector<16x16xf32> -> vector<24x16xf32>
    %cst_97 = arith.constant dense<0.000000e+00> : vector<4x16xf32>
    %157 = tpu.matmul %4, %156, %cst_97 {dimension_numbers = #tpu.dot_dimension_numbers<[1], [0], [0], [1], [0, 0, 1, 1], [], []>} : vector<4x24xf32>, vector<24x16xf32>, vector<4x16xf32> -> vector<4x16xf32>
    %c0_98 = arith.constant 0 : index
    %c112 = arith.constant 112 : index
    %158 = vector.load %arg13[%c0_98, %c112] : memref<4x128xf32, #tpu.memory_space<vmem>>, vector<4x16xf32>
    tpu.vector_store %arg13[%c0_98, %c112], %157 {strides = array<i32>} : memref<4x128xf32, #tpu.memory_space<vmem>>, vector<4x16xf32>,
    %159 = vector.extract_strided_slice %149 {offsets = [0, 0], sizes = [8, 16], strides = [1, 1]} : vector<16x16xf32> to vector<8x16xf32>
    %160 = vector.extract_strided_slice %150 {offsets = [0, 0], sizes = [8, 16], strides = [1, 1]} : vector<16x16xf32> to vector<8x16xf32>
    %161 = vector.extract_strided_slice %151 {offsets = [0, 0], sizes = [8, 16], strides = [1, 1]} : vector<16x16xf32> to vector<8x16xf32>
    %162 = tpu.concatenate %147, %159, %136, %160, %155, %161 in 0 : vector<8x16xf32>, vector<8x16xf32>, vector<8x16xf32>, vector<8x16xf32>, vector<8x16xf32>, vector<8x16xf32> -> vector<48x16xf32>
    %c0_99 = arith.constant 0 : index
    %c0_100 = arith.constant 0 : index
    %163 = vector.load %arg11[%c0_99, %c0_100] : memref<48x16xf32, #tpu.memory_space<vmem>>, vector<48x16xf32>
    tpu.vector_store %arg11[%c0_99, %c0_100], %162 {strides = array<i32>} : memref<48x16xf32, #tpu.memory_space<vmem>>, vector<48x16xf32>,
    %c0_101 = arith.constant 0 : index
    %c0_102 = arith.constant 0 : index
    %164 = vector.load %arg12[%c0_101, %c0_102] : memref<8x16xf32, #tpu.memory_space<vmem>>, vector<8x16xf32>
    tpu.vector_store %arg12[%c0_101, %c0_102], %155 {strides = array<i32>} : memref<8x16xf32, #tpu.memory_space<vmem>>, vector<8x16xf32>,
    %c0_103 = arith.constant 0 : index
    %c0_104 = arith.constant 0 : index
    %165 = vector.load %arg7[%c0_103, %c0_104] : memref<8x4xf32, #tpu.memory_space<vmem>>, vector<8x4xf32>
    %c0_105 = arith.constant 0 : index
    %c0_106 = arith.constant 0 : index
    %166 = vector.load %arg8[%c0_105, %c0_106] : memref<2x8xf32, #tpu.memory_space<vmem>>, vector<2x8xf32>
    %167 = vector.extract_strided_slice %5 {offsets = [8, 0], sizes = [4, 1], strides = [1, 1]} : vector<22x1xf32> to vector<4x1xf32>
    %168 = vector.shape_cast %167 : vector<4x1xf32> to vector<4x1xf32>
    %169 = vector.broadcast %168 : vector<4x1xf32> to vector<4x128xf32>
    %170 = vector.extract_strided_slice %5 {offsets = [12, 0], sizes = [8, 1], strides = [1, 1]} : vector<22x1xf32> to vector<8x1xf32>
    %171 = vector.shape_cast %170 : vector<8x1xf32> to vector<8x1xf32>
    %172 = vector.broadcast %171 : vector<8x1xf32> to vector<8x128xf32>
    %173 = vector.extract_strided_slice %5 {offsets = [20, 0], sizes = [2, 1], strides = [1, 1]} : vector<22x1xf32> to vector<2x1xf32>
    %174 = vector.shape_cast %173 : vector<2x1xf32> to vector<2x1xf32>
    %175 = vector.broadcast %174 : vector<2x1xf32> to vector<2x128xf32>
    %c0_107 = arith.constant 0 : index
    %c0_108 = arith.constant 0 : index
    %176 = vector.load %arg13[%c0_107, %c0_108] : memref<4x128xf32, #tpu.memory_space<vmem>>, vector<4x128xf32>
    %177 = arith.addf %176, %169 : vector<4x128xf32>
    %178 = math.tanh %177 : vector<4x128xf32>
    %cst_109 = arith.constant dense<0.000000e+00> : vector<8x128xf32>
    %179 = tpu.matmul %165, %178, %cst_109 {dimension_numbers = #tpu.dot_dimension_numbers<[1], [0], [0], [1], [0, 0, 1, 1], [], []>} : vector<8x4xf32>, vector<4x128xf32>, vector<8x128xf32> -> vector<8x128xf32>
    %180 = arith.addf %179, %172 : vector<8x128xf32>
    %cst_110 = arith.constant 0.000000e+00 : f32
    %181 = vector.broadcast %cst_110 : f32 to vector<8x128xf32>
    %182 = arith.maximumf %180, %181 : vector<8x128xf32>
    %cst_111 = arith.constant dense<0.000000e+00> : vector<2x128xf32>
    %183 = tpu.matmul %166, %182, %cst_111 {dimension_numbers = #tpu.dot_dimension_numbers<[1], [0], [0], [1], [0, 0, 1, 1], [], []>} : vector<2x8xf32>, vector<8x128xf32>, vector<2x128xf32> -> vector<2x128xf32>
    %184 = arith.addf %183, %175 : vector<2x128xf32>
    %c0_112 = arith.constant 0 : index
    %c0_113 = arith.constant 0 : index
    %c0_114 = arith.constant 0 : index
    %c0_115 = arith.constant 0 : index
    %185 = vector.load %arg10[%c0_112, %c0_113, %c0_114, %c0_115] : memref<1x1x2x128xf32, #tpu.memory_space<vmem>>, vector<1x1x2x128xf32>
    %186 = vector.shape_cast %185 : vector<1x1x2x128xf32> to vector<2x128xf32>
    %187 = vector.shape_cast %184 : vector<2x128xf32> to vector<1x1x2x128xf32>
    tpu.vector_store %arg10[%c0_112, %c0_113, %c0_114, %c0_115], %187 {strides = array<i32>} : memref<1x1x2x128xf32, #tpu.memory_space<vmem>>, vector<1x1x2x128xf32>,
    return
  }
  func.func @transform_0(%arg0: i32, %arg1: i32) -> (i32, i32, i32, i32) {
    %c0_i32 = arith.constant 0 : i32
    %c0_i32_0 = arith.constant 0 : i32
    %c0_i32_1 = arith.constant 0 : i32
    return %arg0, %arg1, %c0_i32, %c0_i32_0 : i32, i32, i32, i32
  }
  func.func @transform_1(%arg0: i32, %arg1: i32) -> (i32, i32, i32, i32) {
    %c0_i32 = arith.constant 0 : i32
    %c0_i32_0 = arith.constant 0 : i32
    %c0_i32_1 = arith.constant 0 : i32
    return %arg0, %arg1, %c0_i32, %c0_i32_0 : i32, i32, i32, i32
  }
  func.func @transform_2(%arg0: i32, %arg1: i32) -> (i32, i32, i32) {
    %c0_i32 = arith.constant 0 : i32
    %c0_i32_0 = arith.constant 0 : i32
    %c0_i32_1 = arith.constant 0 : i32
    return %arg0, %c0_i32, %c0_i32_0 : i32, i32, i32
  }
  func.func @transform_3(%arg0: i32, %arg1: i32) -> (i32, i32) {
    %c0_i32 = arith.constant 0 : i32
    %c0_i32_0 = arith.constant 0 : i32
    %c0_i32_1 = arith.constant 0 : i32
    return %c0_i32, %c0_i32_0 : i32, i32
  }
  func.func @transform_4(%arg0: i32, %arg1: i32) -> (i32, i32) {
    %c0_i32 = arith.constant 0 : i32
    %c0_i32_0 = arith.constant 0 : i32
    %c0_i32_1 = arith.constant 0 : i32
    return %c0_i32, %c0_i32_0 : i32, i32
  }
  func.func @transform_5(%arg0: i32, %arg1: i32) -> (i32, i32) {
    %c0_i32 = arith.constant 0 : i32
    %c0_i32_0 = arith.constant 0 : i32
    %c0_i32_1 = arith.constant 0 : i32
    return %c0_i32, %c0_i32_0 : i32, i32
  }
  func.func @transform_6(%arg0: i32, %arg1: i32) -> (i32, i32) {
    %c0_i32 = arith.constant 0 : i32
    %c0_i32_0 = arith.constant 0 : i32
    %c0_i32_1 = arith.constant 0 : i32
    return %c0_i32, %c0_i32_0 : i32, i32
  }
  func.func @transform_7(%arg0: i32, %arg1: i32) -> (i32, i32) {
    %c0_i32 = arith.constant 0 : i32
    %c0_i32_0 = arith.constant 0 : i32
    %c0_i32_1 = arith.constant 0 : i32
    return %c0_i32, %c0_i32_0 : i32, i32
  }
  func.func @transform_8(%arg0: i32, %arg1: i32) -> (i32, i32, i32, i32) {
    %c0_i32 = arith.constant 0 : i32
    %c0_i32_0 = arith.constant 0 : i32
    %c0_i32_1 = arith.constant 0 : i32
    return %arg0, %arg1, %c0_i32, %c0_i32_0 : i32, i32, i32, i32
  }
}

</mosaic_0001>

<bundles_post_ra>
// kernel: tpu_custom_call.1
= control target key start
LH: loop header
LB: loop body
LE: loop exit
PB: predicated region body
PF: predicated region fallthrough
CT: control target
= control target key end

     0   :  { %s4175_s0 = inlined_call_operand.hbm [shape: f32[2,8,8,16], index: 0, kind: input, shape index: {}]   ;;  %s4176_s1 = inlined_call_operand.hbm [shape: f32[2,8,16,16], index: 1, kind: input, shape index: {}]   ;;  %s4177_s2 = inlined_call_operand.vmem [shape: f32[2,8,16], index: 2, kind: input, shape index: {}]   ;;  %s4178_s3 = inlined_call_operand.vmem [shape: f32[8,48], index: 3, kind: input, shape index: {}]   ;;  %s4179_s4 = inlined_call_operand.vmem [shape: f32[4,24], index: 4, kind: input, shape index: {}]   ;;  %s4180_s5 = inlined_call_operand.vmem [shape: f32[8,4], index: 5, kind: input, shape index: {}]   ;;  %s4181_s6 = inlined_call_operand.vmem [shape: f32[2,8], index: 6, kind: input, shape index: {}]   ;;  %s4182_s7 = inlined_call_operand.vmem [shape: f32[22,1], index: 7, kind: input, shape index: {}]   ;;  %s4183_s8 = inlined_call_operand.hbm [shape: f32[2,1,2,128], index: 8, kind: output, shape index: {}]  }
   0x1   :  { %4188 = sst [smem:[#allocation19_spill]] %s4175_s0 }
   0x2   :  { %13 = vsyncpa [#allocation6], 0 }
   0x3   :  { %15 = vsyncpa [#allocation6 + $0x1], 0 }
   0x4   :  { %16 = vsyncpa [#allocation9], 0 }
   0x5   :  { %18 = vsyncpa [#allocation9 + $0x1], 0 }
   0x6   :  { %19 = vsyncpa [#allocation7], 0 }
   0x7   :  { %21 = vsyncpa [#allocation7 + $0x1], 0  ;;  %s3728_s27 = smov 0   ;;  %s3730_s28 = smov 0  }
   0x8   :  { %s3732_s29 = smov 0   ;;  %s3734_s30 = smov 0  }
   0x9   :  { %s3736_s9 = smov 0   ;;  %s3738_s10 = smov 0  }
   0xa LB: > { %4189 = sst [smem:[#allocation14_spill]] %s3646_s27  ;;  %s2856_s11 = sadd.s32 4294967295, %s3666_s10   ;;  %s3666_s10 = sphi %s3738_s10, %s27_s10   ;;  %s3662_s9 = sphi %s3736_s9, %s4209_s9   ;;  %s3658_s30 = sphi %s3734_s30, %s4208_s30   ;;  %s3654_s29 = sphi %s3732_s29, %s4204_s29   ;;  %s3650_s28 = sphi %s3730_s28, %s4207_s28   ;;  %s3646_s27 = sphi %s3728_s27, %s4206_s27  }
   0xb   : > { %4190 = sst [smem:[#allocation15_spill]] %s3654_s29  ;;  %s2857_s12 = sadd.s32 4294967294, %s3666_s10  }
   0xc   : > { %s39_s13 = sadd.s32 1, %s3662_s9  ;;  %s48_s14 = sadd.s32 1, %s3654_s29 }
   0xd   : > { %p41_p0 = scmp.ge.s32.totalorder %s39_s13, 2  ;;  %p55_p1 = scmp.ne.s32.totalorder %s3654_s29, %s3650_s28 }
   0xe   : > { %p56_p2 = scmp.eq.s32.totalorder %s3666_s10, 0  ;;  %p61_p3 = scmp.ne.s32.totalorder %s3650_s28, %s3646_s27 }
   0xf   : > { %s4211_s13 = smov (%p41_p0, %s39_s13), 0  ;;  %p62_p5 = scmp.eq.s32.totalorder %s2856_s11, 0 }
  0x10   : > { %4191 = sst [smem:[#allocation16_spill]] %s4211_s13  ;;  %p3769_p4 = por %p56_p2, %p55_p1 }
  0x11   : > { %s43_s16 = ssub.s32 %s3662_s9, %s4211_s13  ;;  %p246_p6 = scmp.eq.s32.totalorder %s2856_s11, 1 }
  0x12   : > { %p46_p7 = scmp.eq.s32.totalorder %s43_s16, 0  ;;  %p3775_p8 = por %p62_p5, %p61_p3 }
  0x13   : > { %p3779_p9 = por %p246_p6, %p55_p1  ;;  %p252_p10 = scmp.eq.s32.totalorder %s2857_s12, 1 }
  0x14   : > { %s3784_s19 = scalar_select %p46_p7, %s3654_s29, %s48_s14  }
  0x15   : > { %p3786_p11 = por %p252_p10, %p61_p3  ;;  %p2859_p12 = scmp.ge.s32.totalorder %s3666_s10, 2 }
  0x16   : > { %4195 = sst [smem:[#allocation17_spill]] %s3784_s19  ;;  %p3444_p13 = scmp.lt.s32.totalorder %s3666_s10, 2 }
  0x17   : > { %s4196_s20 = scalar_select %p3786_p11, 1, 0 }
  0x18   : > { %s3793_s21 = sand.u32 1, %s3654_s29   ;;  %s2963_s23 = sshll.u32 %s3662_s9, 10 }
  0x19   : > { %4197 = sst [smem:[#allocation18_spill]] %s4196_s20  ;;  %s2860_s22 = sshll.u32 %s3793_s21, 6 }
  0x1a   : > { %s4198_s0 = sld [smem:[#allocation19_spill]]  ;;  %s291_s11 = scalar_lea.vmem [#allocation5], %s2860_s22 }
  0x1b   : > { %s300_s12 = sshll.u32 %s291_s11, 4  ;;  %p3802_p0 = pnand %p3444_p13, %p3769_p4  ;;  %s301_s12 = int_to_ptr.vmem [resolvable:$true] %s300_s12 }
  0x1c   : > { %p2866_p1 = scmp.ge.s32.totalorder %s3666_s10, 1  ;;  %s288_s16 = scalar_lea.sflag [#allocation6], %s3793_s21 }
  0x1d   : > { %p3528_p2 = pneg %p3802_p0  ;;  %s3539_s13 = scalar_lea.vmem %s301_s12, 1024 }
  0x1e   : > { %p3540_p3 = scmp.ne.s32.totalorder %s301_s12, %s3539_s13  ;;  %s3668_s22 = smov [#allocation5]  }
  0x20   : > { %s299_s26 = scalar_lea.hbm %s4198_s0, %s2963_s23  ;;  %p3542_p5 = pnand %p3540_p3, %p3528_p2 }
  0x21   : > { %s3544_s23 = sshll.u32 %s3668_s22, 4  ;;  %s3545_s23 = int_to_ptr.vmem [resolvable:$false] %s3544_s23 }
  0x22   : > { %p3543_p6 = pneg %p3542_p5  ;;  %s3546_s15 = scalar_lea.vmem %s3545_s23, 2048 }
  0x23   : > { %p3547_p4 = scmp.lt.s32.totalorder %s301_s12, %s3545_s23  ;;  %p3548_p7 = scmp.lt.s32.totalorder %s3546_s15, %s3539_s13 }
  0x25   : > { %p3549_p10 = por %p3548_p7, %p3547_p4 }
  0x27   : > { %p3550_p13 = pnand %p3549_p10, %p3543_p6 }
  0x29   : > { %3553 = shalt.err (!%p3550_p13)
}
  0x2a   : > { %s3669_s24 = smov 128   ;;  %s3670_s25 = smov 8  }
  0x2b   : > { %3436 = dma.hbm_to_vmem [thread:$0]  (!%p3802_p0), %s299_s26, 1024, %s301_s12, %s288_s16, %s3669_s24, %s3669_s24, %s3670_s25  }
  0x2c   : > { %p339_p3 = scmp.lt.s32.totalorder %s3666_s10, 3  ;;  %s2863_s11 = sshll.u32 %s3793_s21, 7 }
  0x2d   : > { %s2964_s22 = sshll.u32 %s3662_s9, 11  ;;  %s314_s19 = scalar_lea.vmem [#allocation8], %s2863_s11 }
  0x2e   : > { %p3820_p5 = pnand %p2866_p1, %p339_p3  ;;  %s323_s0 = scalar_lea.hbm %s4176_s1, %s2964_s22 }
  0x2f   : > { %s324_s29 = sshll.u32 %s314_s19, 4  ;;  %s311_s20 = scalar_lea.sflag [#allocation9], %s3793_s21  ;;  %s325_s29 = int_to_ptr.vmem [resolvable:$true] %s324_s29 }
  0x30   : > { %s3567_s27 = scalar_lea.vmem %s325_s29, 2048  ;;  %s3671_s26 = smov [#allocation8]  }
  0x31   : > { %p3568_p6 = scmp.ne.s32.totalorder %s325_s29, %s3567_s27  ;;  %s3572_s12 = sshll.u32 %s3671_s26, 4  ;;  %s3573_s12 = int_to_ptr.vmem [resolvable:$false] %s3572_s12 }
  0x32   : > { %s3574_s16 = scalar_lea.vmem %s3573_s12, 4096  ;;  %p3575_p1 = scmp.lt.s32.totalorder %s325_s29, %s3573_s12 }
  0x33   : > { %p3570_p4 = pnand %p3568_p6, %p3528_p2  ;;  %p3576_p10 = scmp.lt.s32.totalorder %s3574_s16, %s3567_s27 }
  0x35   : > { %p3571_p7 = pneg %p3570_p4  ;;  %p3577_p13 = por %p3576_p10, %p3575_p1 }
  0x37   : > { %p3578_p3 = pnand %p3577_p13, %p3571_p7 }
  0x39   : > { %3581 = shalt.err (!%p3578_p3)
}
  0x3a   : > { %3439 = dma.hbm_to_vmem [thread:$0]  (!%p3802_p0), %s323_s0, 2048, %s325_s29, %s311_s20, %s3669_s24, %s3669_s24, %s3670_s25  }
  0x3b   : > { %343 = sbr.rel (%p3820_p5) target bundleno = 2796 (0xaec), region = 52  ;;  %s3836_s19 = sand.u32 (!%p3820_p5), 1, %s3650_s28  }
  0x3c   : > { %s2867_s21 = sshll.u32 (!%p3820_p5), %s3836_s19, 6  ;;  %s346_s11 = scalar_lea.sflag (!%p3820_p5), [#allocation6], %s3836_s19 }
  0x3d   : > { %s3840_s22 = scalar_lea.vmem (!%p3820_p5), [#allocation5], %s2867_s21 }
  0x40   : > { %3633 = dma.done.wait (%p3775_p8), %s346_s11, 1024  }
  0x41   : > { %3635 = vsyncadd (%p3775_p8), %s346_s11, 4294966272  ;;  %s2868_s0 = sshll.u32 %s3836_s19, 7  ;;  %s355_s27 = scalar_lea.sflag [#allocation9], %s3836_s19 }
  0x42   : > { %s3848_s29 = scalar_lea.vmem [#allocation8], %s2868_s0 }
  0x43   : > { %3637 = dma.done.wait (%p3775_p8), %s355_s27, 2048  }
  0x44   : > { %3639 = vsyncadd (%p3775_p8), %s355_s27, 4294965248  ;;  %vm410_vm0 = vcmask 130048   ;;  %v3672_v0 = vmov 0.0   ;;  %v437_v1 = vld [vmem:[%s3848_s29 + $0x8] sm:$0xff]  ;;  %v436_v2 = vld [vmem:[%s3848_s29] sm:$0xff]  ;;  %p402_p8 = scmp.lt.s32.totalorder %s3658_s30, 1 }
  0x45   : > { %411 = vst.msk [vmem:[#allocation2] sm:$0xff] %vm410_vm0, %v3672_v0  ;;  %412 = vst.msk [vmem:[#allocation2 + $0x8] sm:$0xff] %vm410_vm0, %v3672_v0  ;;  %3134 = vmatprep.subr.mxu1 %v3672_v0  ;;  %3121 = vmatprep.subr.mxu0 %v437_v1  ;;  %vm3673_vm1 = vmmov 0   ;;  %v421_v10 = vld [vmem:[%s4182_s7] sm:$0xff]  ;;  %v3674_v11 = vmov 0   ;;  %vm553_vm2 = vcmask 392192  }
  0x46   : > { %413 = vst.msk [vmem:[#allocation2 + $0x10] sm:$0xff] %vm410_vm0, %v3672_v0  ;;  %414 = vst.msk [vmem:[#allocation2 + $0x18] sm:$0xff] %vm410_vm0, %v3672_v0  ;;  %3122 = vmatpush3.msra.mxu0 %v437_v1  ;;  %s403_s17 = scalar_select %p402_p8, %s3658_s30, 1  ;;  %3146 = vmatprep.mubr.msk.f32.mxu1 %vm3673_vm1, %v3672_v0  ;;  %v438_v17 = vld [vmem:[%s3840_s22] sm:$0xff]  ;;  %v2880_v19 = vld [vmem:[%s3848_s29 + $0x18] sm:$0xff]  ;;  %vm628_vm3 = vcmask 195584  }
  0x47   : > { %415 = vst.msk [vmem:[#allocation2 + $0x20] sm:$0xff] %vm410_vm0, %v3672_v0  ;;  %416 = vst.msk [vmem:[#allocation2 + $0x28] sm:$0xff] %vm410_vm0, %v3672_v0  ;;  %3123 = vmatprep.subr.mxu0 %v436_v2  ;;  %3506 = vset.pattern.permute.xlu0 %v3674_v11  ;;  %v3897_v18 = vld [vmem:[%s4178_s3] sm:$0xff]  ;;  %v2879_v20 = vld [vmem:[%s3848_s29 + $0x10] sm:$0xff]  ;;  %vm702_vm4 = vcmask 125952   ;;  %s3675_s21 = smov 16  }
  0x48   : > { %3124 = vmatpush3.msra.mxu0 %v436_v2  ;;  %s2870_s20 = sshll.u32 %s403_s17, 3  ;;  %3507 = vset.pattern.permute.xlu1 %v3674_v11  ;;  %v3917_v29 = vld [vmem:[%s4179_s4] sm:$0xf]  ;;  %v2881_v33 = vld [vmem:[%s3840_s22 + $0x8] sm:$0xff]  ;;  %v2892_v48 = vld [vmem:[%s3840_s22 + $0x10] sm:$0xff]  ;;  %vm967_vm5 = vcmask 257152  }
  0x49   : > { %3149 = vmatprep.subr.mxu0 %v3672_v0  ;;  %s405_s25 = scalar_lea.vmem %s4177_s2, %s2870_s20  ;;  %426 = vperm.xlu0 %3506, %v421_v10   ;;  %v2891_v34 = vld [vmem:[%s3848_s29 + $0x28] sm:$0xff]  ;;  %v2890_v35 = vld [vmem:[%s3848_s29 + $0x20] sm:$0xff]  ;;  %v2902_v49 = vld [vmem:[%s3848_s29 + $0x38] sm:$0xff]  ;;  %s3676_s11 = smov 32   ;;  %vm1229_vm6 = vcmask 388352   ;;  %vm1491_vm7 = vcmask 519552  }
  0x4a   : > { %v417_v7 = vld [vmem:[%s405_s25] sm:$0xff]  ;;  %v2901_v50 = vld [vmem:[%s3848_s29 + $0x30] sm:$0xff]  ;;  %v2903_v63 = vld [vmem:[%s3840_s22 + $0x18] sm:$0xff]  ;;  %s3677_s0 = smov 48   ;;  %s3678_s27 = smov 64   ;;  %vm1753_vm8 = vcmask 650752  }
  0x4b   : > { %418 = vst.msk [vmem:[#allocation3] sm:$0xff] %vm410_vm0, %v417_v7  ;;  %v2913_v1 = vld [vmem:[%s3848_s29 + $0x48] sm:$0xff]  ;;  %v2912_v2 = vld [vmem:[%s3848_s29 + $0x40] sm:$0xff]  ;;  %vm2015_vm9 = vcmask 781952   ;;  %vm2277_vm10 = vcmask 913152   ;;  %s3681_s14 = smov 112  }
  0x4c   : > { %v429_v3 = vld [vmem:[#allocation2] sm:$0xff]  ;;  %v430_v4 = vld [vmem:[#allocation2 + $0x8] sm:$0xff]  ;;  %vm2539_vm11 = vcmask 1044352   ;;  %vm2567_vm12 = vcmask 31744   ;;  %vm2562_vm13 = vcmask 1043456   ;;  %vm2646_vm14 = vcmask 64512  }
  0x4d   : > { %3125 = vmatprep.mubr.msk.f32.mxu0 %vm410_vm0, %v429_v3  ;;  %v431_v5 = vld [vmem:[#allocation2 + $0x10] sm:$0xff]  ;;  %v432_v6 = vld [vmem:[#allocation2 + $0x18] sm:$0xff]  ;;  %s2869_s12 = sshll.u32 %s3836_s19, 1  ;;  %s2960_s16 = sshll.u32 %s3658_s30, 5 }
  0x4e   : > { %3126 = vmatmul.mubr.msk.f32.vlgmr.msra.gmra.mxu0 %vm410_vm0, %v430_v4  ;;  %v433_v8 = vld [vmem:[#allocation2 + $0x20] sm:$0xff]  ;;  %v434_v9 = vld [vmem:[#allocation2 + $0x28] sm:$0xff]  ;;  %s3682_s20 = smov [#allocation10]  }
  0x4f   : > { %3128 = vmatprep.mubr.msk.f32.mxu0 %vm410_vm0, %v431_v5  ;;  %s3586_s30 = sshll.u32 %s3682_s20, 4  ;;  %s3587_s30 = int_to_ptr.vmem [resolvable:$false] %s3586_s30 }
  0x52   : > { %3129 = vmatmul.mubr.msk.f32.gmra.mxu0 %vm410_vm0, %v432_v6  ;;  %v435_v16 = vld [vmem:[#allocation3] sm:$0xff] }
  0x53   : > { %3131 = vmatprep.mubr.msk.f32.mxu0 %vm410_vm0, %v433_v8 }
  0x56   : > { %3132 = vmatmul.mubr.msk.f32.gmra.mxu0 %vm410_vm0, %v434_v9 }
  0x57   : > { %3155 = vmatprep.mubr.msk.f32.mxu0 %vm3673_vm1, %v3672_v0 }
  0xc4   : > { %v3911_v23 = vpop.permute.xlu0 %426 }
 0x10e   : > { %v3127_v12 = vpop.f32.mrf.mxu0 }
 0x110   : > { %v524_v13 = vpop.f32.mrf.mxu0 }
 0x112   : > { %v3130_v14 = vpop.f32.mrf.mxu0 }
 0x113   : > { %3135 = vmatpush3.msra.mxu1 %v3130_v14 }
 0x114   : > { %v534_v15 = vpop.f32.mrf.mxu0  ;;  %3136 = vmatprep.subr.mxu1 %v3672_v0 }
 0x115   : > { %3137 = vmatpush3.msra.mxu1 %v534_v15 }
 0x116   : > { %3138 = vmatprep.subr.mxu1 %v3672_v0  ;;  %v3133_v21 = vpop.f32.mrf.mxu0 }
 0x117   : > { %3139 = vmatpush3.msra.mxu1 %v435_v16  ;;  %3150 = vmatpush3.msra.mxu0 %v3133_v21 }
 0x118   : > { %3140 = vmatprep.subr.mxu1 %v3672_v0  ;;  %v544_v22 = vpop.f32.mrf.mxu0  ;;  %3151 = vmatprep.subr.mxu0 %v3672_v0 }
 0x119   : > { %3141 = vmatpush3.msra.mxu1 %v3127_v12  ;;  %3152 = vmatpush3.msra.mxu0 %v544_v22 }
 0x11a   : > { %3142 = vmatprep.subr.mxu1 %v3672_v0  ;;  %3153 = vmatprep.subr.mxu0 %v3672_v0 }
 0x11b   : > { %3143 = vmatpush3.msra.mxu1 %v524_v13 }
 0x11c   : > { %3144 = vmatprep.subr.mxu1 %v3672_v0 }
 0x11d   : > { %3145 = vmatpush3.msra.mxu1 %v438_v17 }
 0x11e   : > { %3147 = vmatmul.mubr.msk.f32.vlgmr.msra.gmra.mxu1 %vm553_vm2, %v3897_v18  ;;  %3158 = vmatprep.subr.mxu1 %v2880_v19 }
 0x11f   : > { %3159 = vmatpush3.msra.mxu1 %v2880_v19  ;;  %3162 = vmatprep.mubr.msk.f32.mxu1 %vm410_vm0, %v438_v17  ;;  %v2924_v17 = vld [vmem:[%s3848_s29 + $0x58] sm:$0xff]  ;;  %v2923_v19 = vld [vmem:[%s3848_s29 + $0x50] sm:$0xff] }
 0x120   : > { %3160 = vmatprep.subr.mxu1 %v2879_v20 }
 0x121   : > { %3161 = vmatpush3.msra.mxu1 %v2879_v20 }
 0x122   : > { %3163 = vmatmul.mubr.msk.f32.vlgmr.msra.gmra.mxu1 %vm410_vm0, %v524_v13  ;;  %3186 = vmatprep.subr.mxu1 %v3672_v0 }
 0x123   : > { %3165 = vmatprep.mubr.msk.f32.mxu1 %vm410_vm0, %v435_v16  ;;  %v2914_v16 = vld [vmem:[%s3840_s22 + $0x20] sm:$0xff] }
 0x126   : > { %3166 = vmatmul.mubr.msk.f32.gmra.mxu1 %vm410_vm0, %v534_v15 }
 0x1de   : > { %v623_v24 = vpop.f32.mrf.mxu1 }
 0x1df   : > { %v624_v25 = vadd.f32 %v623_v24, %v3911_v23 }
 0x1e0   : > { %v3148_v26 = vpop.f32.mrf.mxu1 }
 0x1e1   : > { %3508 = vtanh.f32 %v624_v25 }
 0x1e2   : > { %v3164_v27 = vpop.f32.mrf.mxu1 }
 0x1e4   : > { %v793_v28 = vpop.f32.mrf.mxu1 }
 0x1e6   : > { %v3167_v31 = vpop.f32.mrf.mxu1 }
 0x1e8   : > { %v803_v32 = vpop.f32.mrf.mxu1 }
 0x1ee   : > { %v3509_v30 = vpop.eup %3508 }
 0x1ef   : > { %3154 = vmatpush3.msra.mxu0 %v3509_v30  ;;  %3168 = vmatprep.mubr.msk.f32.mxu1 %vm410_vm0, %v3509_v30 }
 0x1f0   : > { %3156 = vmatmul.mubr.msk.f32.vlgmr.msra.gmra.mxu0 %vm628_vm3, %v3917_v29  ;;  %3169 = vmatmul.mubr.msk.f32.gmra.mxu1 %vm410_vm0, %v544_v22 }
 0x1f1   : > { %3171 = vmatprep.subr.mxu0 %v3672_v0  ;;  %3183 = vmatprep.mubr.msk.f32.mxu0 %vm3673_vm1, %v3672_v0 }
 0x1f2   : > { %3172 = vmatpush3.msra.mxu0 %v3167_v31  ;;  %3192 = vmatprep.mubr.msk.f32.mxu1 %vm3673_vm1, %v3672_v0 }
 0x1f3   : > { %3173 = vmatprep.subr.mxu0 %v3672_v0 }
 0x1f4   : > { %3174 = vmatpush3.msra.mxu0 %v803_v32 }
 0x1f5   : > { %3175 = vmatprep.subr.mxu0 %v3672_v0 }
 0x1f6   : > { %3176 = vmatpush3.msra.mxu0 %v3509_v30 }
 0x1f7   : > { %3177 = vmatprep.subr.mxu0 %v3672_v0 }
 0x1f8   : > { %3178 = vmatpush3.msra.mxu0 %v3164_v27 }
 0x1f9   : > { %3179 = vmatprep.subr.mxu0 %v3672_v0 }
 0x1fa   : > { %3180 = vmatpush3.msra.mxu0 %v793_v28 }
 0x1fb   : > { %3181 = vmatprep.subr.mxu0 %v3672_v0 }
 0x1fc   : > { %3182 = vmatpush3.msra.mxu0 %v2881_v33 }
 0x1fd   : > { %3184 = vmatmul.mubr.msk.f32.vlgmr.msra.gmra.mxu0 %vm553_vm2, %v3897_v18  ;;  %3195 = vmatprep.subr.mxu0 %v2891_v34 }
 0x1fe   : > { %3196 = vmatpush3.msra.mxu0 %v2891_v34  ;;  %3199 = vmatprep.mubr.msk.f32.mxu0 %vm410_vm0, %v2881_v33 }
 0x1ff   : > { %3197 = vmatprep.subr.mxu0 %v2890_v35 }
 0x200   : > { %3198 = vmatpush3.msra.mxu0 %v2890_v35  ;;  %v2925_v35 = vld [vmem:[%s3840_s22 + $0x28] sm:$0xff] }
 0x201   : > { %3200 = vmatmul.mubr.msk.f32.vlgmr.msra.gmra.mxu0 %vm410_vm0, %v793_v28  ;;  %3223 = vmatprep.subr.mxu0 %v3672_v0 }
 0x202   : > { %3202 = vmatprep.mubr.msk.f32.mxu0 %vm410_vm0, %v3509_v30 }
 0x205   : > { %3203 = vmatmul.mubr.msk.f32.gmra.mxu0 %vm410_vm0, %v803_v32 }
 0x2b0   : > { %v698_v36 = vpop.f32.mrf.mxu0  ;;  %v3170_v37 = vpop.f32.mrf.mxu1 }
 0x2b1   : > { %703 = vst.msk [vmem:[#allocation4] sm:$0xf] %vm702_vm4, %v698_v36  ;;  %3187 = vmatpush3.msra.mxu1 %v3170_v37  ;;  %v2935_v36 = vld [vmem:[%s3848_s29 + $0x68] sm:$0xff]  ;;  %v2934_v37 = vld [vmem:[%s3848_s29 + $0x60] sm:$0xff] }
 0x2b2   : > { %v3157_v38 = vpop.f32.mrf.mxu0  ;;  %v813_v39 = vpop.f32.mrf.mxu1  ;;  %3188 = vmatprep.subr.mxu1 %v3672_v0 }
 0x2b3   : > { %3189 = vmatpush3.msra.mxu1 %v813_v39 }
 0x2b4   : > { %3190 = vmatprep.subr.mxu1 %v3672_v0 }
 0x2bd   : > { %v888_v40 = vpop.f32.mrf.mxu0 }
 0x2be   : > { %v889_v41 = vadd.f32 %v888_v40, %v3911_v23 }
 0x2bf   : > { %v3185_v42 = vpop.f32.mrf.mxu0 }
 0x2c0   : > { %3510 = vtanh.f32 %v889_v41 }
 0x2c1   : > { %v3201_v43 = vpop.f32.mrf.mxu0 }
 0x2c3   : > { %v1055_v44 = vpop.f32.mrf.mxu0 }
 0x2c5   : > { %v3204_v46 = vpop.f32.mrf.mxu0 }
 0x2c7   : > { %v1065_v47 = vpop.f32.mrf.mxu0 }
 0x2cd   : > { %v3511_v45 = vpop.eup %3510 }
 0x2ce   : > { %3191 = vmatpush3.msra.mxu1 %v3511_v45  ;;  %3205 = vmatprep.mubr.msk.f32.mxu0 %vm410_vm0, %v3511_v45 }
 0x2cf   : > { %3193 = vmatmul.mubr.msk.f32.vlgmr.msra.gmra.mxu1 %vm628_vm3, %v3917_v29  ;;  %3206 = vmatmul.mubr.msk.f32.gmra.mxu0 %vm410_vm0, %v813_v39 }
 0x2d0   : > { %3208 = vmatprep.subr.mxu1 %v3672_v0  ;;  %3220 = vmatprep.mubr.msk.f32.mxu1 %vm3673_vm1, %v3672_v0 }
 0x2d1   : > { %3209 = vmatpush3.msra.mxu1 %v3204_v46  ;;  %3229 = vmatprep.mubr.msk.f32.mxu0 %vm3673_vm1, %v3672_v0 }
 0x2d2   : > { %3210 = vmatprep.subr.mxu1 %v3672_v0 }
 0x2d3   : > { %3211 = vmatpush3.msra.mxu1 %v1065_v47 }
 0x2d4   : > { %3212 = vmatprep.subr.mxu1 %v3672_v0 }
 0x2d5   : > { %3213 = vmatpush3.msra.mxu1 %v3511_v45 }
 0x2d6   : > { %3214 = vmatprep.subr.mxu1 %v3672_v0 }
 0x2d7   : > { %3215 = vmatpush3.msra.mxu1 %v3201_v43 }
 0x2d8   : > { %3216 = vmatprep.subr.mxu1 %v3672_v0 }
 0x2d9   : > { %3217 = vmatpush3.msra.mxu1 %v1055_v44 }
 0x2da   : > { %3218 = vmatprep.subr.mxu1 %v3672_v0 }
 0x2db   : > { %3219 = vmatpush3.msra.mxu1 %v2892_v48 }
 0x2dc   : > { %3221 = vmatmul.mubr.msk.f32.vlgmr.msra.gmra.mxu1 %vm553_vm2, %v3897_v18  ;;  %3232 = vmatprep.subr.mxu1 %v2902_v49 }
 0x2dd   : > { %3233 = vmatpush3.msra.mxu1 %v2902_v49  ;;  %3236 = vmatprep.mubr.msk.f32.mxu1 %vm410_vm0, %v2892_v48 }
 0x2de   : > { %3234 = vmatprep.subr.mxu1 %v2901_v50 }
 0x2df   : > { %3235 = vmatpush3.msra.mxu1 %v2901_v50 }
 0x2e0   : > { %3237 = vmatmul.mubr.msk.f32.vlgmr.msra.gmra.mxu1 %vm410_vm0, %v1055_v44  ;;  %3260 = vmatprep.subr.mxu1 %v3672_v0 }
 0x2e1   : > { %3239 = vmatprep.mubr.msk.f32.mxu1 %vm410_vm0, %v3511_v45 }
 0x2e4   : > { %3240 = vmatmul.mubr.msk.f32.gmra.mxu1 %vm410_vm0, %v1065_v47 }
 0x38f   : > { %v959_v51 = vpop.f32.mrf.mxu1  ;;  %v3207_v52 = vpop.f32.mrf.mxu0 }
 0x390   : > { %3224 = vmatpush3.msra.mxu0 %v3207_v52  ;;  %964 = vrot.lane.b32.xlu0 %v959_v51, %s3675_s21  ;;  %v2936_v51 = vld [vmem:[%s3840_s22 + $0x30] sm:$0xff]  ;;  %v2946_v52 = vld [vmem:[%s3848_s29 + $0x78] sm:$0xff]  ;;  %s399_s21 = scalar_lea.vmem [#allocation10], %s2869_s12 }
 0x391   : > { %v3194_v53 = vpop.f32.mrf.mxu1  ;;  %v1075_v54 = vpop.f32.mrf.mxu0  ;;  %3225 = vmatprep.subr.mxu0 %v3672_v0 }
 0x392   : > { %3226 = vmatpush3.msra.mxu0 %v1075_v54  ;;  %v2945_v53 = vld [vmem:[%s3848_s29 + $0x70] sm:$0xff]  ;;  %s3679_s29 = smov 80  }
 0x393   : > { %3227 = vmatprep.subr.mxu0 %v3672_v0 }
 0x39c   : > { %v1150_v55 = vpop.f32.mrf.mxu1 }
 0x39d   : > { %v1151_v56 = vadd.f32 %v1150_v55, %v3911_v23  ;;  %v2947_v55 = vld [vmem:[%s3840_s22 + $0x38] sm:$0xff]  ;;  %s3680_s22 = smov 96  }
 0x39e   : > { %v3222_v57 = vpop.f32.mrf.mxu1  ;;  %2541 = vst.msk [vmem:[#allocation2] sm:$0xff] %vm410_vm0, %v2947_v55 }
 0x39f   : > { %3512 = vtanh.f32 %v1151_v56 }
 0x3a0   : > { %v3238_v58 = vpop.f32.mrf.mxu1 }
 0x3a2   : > { %v1317_v59 = vpop.f32.mrf.mxu1 }
 0x3a4   : > { %v3241_v61 = vpop.f32.mrf.mxu1 }
 0x3a6   : > { %v1327_v62 = vpop.f32.mrf.mxu1 }
 0x3ac   : > { %v3513_v60 = vpop.eup %3512 }
 0x3ad   : > { %3228 = vmatpush3.msra.mxu0 %v3513_v60  ;;  %3242 = vmatprep.mubr.msk.f32.mxu1 %vm410_vm0, %v3513_v60 }
 0x3ae   : > { %3230 = vmatmul.mubr.msk.f32.vlgmr.msra.gmra.mxu0 %vm628_vm3, %v3917_v29  ;;  %3243 = vmatmul.mubr.msk.f32.gmra.mxu1 %vm410_vm0, %v1075_v54 }
 0x3af   : > { %3245 = vmatprep.subr.mxu0 %v3672_v0  ;;  %3257 = vmatprep.mubr.msk.f32.mxu0 %vm3673_vm1, %v3672_v0 }
 0x3b0   : > { %3246 = vmatpush3.msra.mxu0 %v3241_v61  ;;  %3266 = vmatprep.mubr.msk.f32.mxu1 %vm3673_vm1, %v3672_v0 }
 0x3b1   : > { %3247 = vmatprep.subr.mxu0 %v3672_v0 }
 0x3b2   : > { %3248 = vmatpush3.msra.mxu0 %v1327_v62 }
 0x3b3   : > { %3249 = vmatprep.subr.mxu0 %v3672_v0 }
 0x3b4   : > { %3250 = vmatpush3.msra.mxu0 %v3513_v60 }
 0x3b5   : > { %3251 = vmatprep.subr.mxu0 %v3672_v0 }
 0x3b6   : > { %3252 = vmatpush3.msra.mxu0 %v3238_v58 }
 0x3b7   : > { %3253 = vmatprep.subr.mxu0 %v3672_v0 }
 0x3b8   : > { %3254 = vmatpush3.msra.mxu0 %v1317_v59 }
 0x3b9   : > { %3255 = vmatprep.subr.mxu0 %v3672_v0 }
 0x3ba   : > { %3256 = vmatpush3.msra.mxu0 %v2903_v63 }
 0x3bb   : > { %3258 = vmatmul.mubr.msk.f32.vlgmr.msra.gmra.mxu0 %vm553_vm2, %v3897_v18  ;;  %3269 = vmatprep.subr.mxu0 %v2913_v1 }
 0x3bc   : > { %3270 = vmatpush3.msra.mxu0 %v2913_v1  ;;  %3273 = vmatprep.mubr.msk.f32.mxu0 %vm410_vm0, %v2903_v63 }
 0x3bd   : > { %3271 = vmatprep.subr.mxu0 %v2912_v2 }
 0x3be   : > { %3272 = vmatpush3.msra.mxu0 %v2912_v2 }
 0x3bf   : > { %3274 = vmatmul.mubr.msk.f32.vlgmr.msra.gmra.mxu0 %vm410_vm0, %v1317_v59  ;;  %3297 = vmatprep.subr.mxu0 %v3672_v0 }
 0x3c0   : > { %3276 = vmatprep.mubr.msk.f32.mxu0 %vm410_vm0, %v3513_v60 }
 0x3c3   : > { %3277 = vmatmul.mubr.msk.f32.gmra.mxu0 %vm410_vm0, %v1327_v62 }
 0x402   : > { %v965_v3 = vpop.permute.xlu0 %964 }
 0x403   : > { %968 = vst.msk [vmem:[#allocation4] sm:$0xf] %vm967_vm5, %v965_v3 }
 0x46e   : > { %v1221_v4 = vpop.f32.mrf.mxu0  ;;  %v3244_v5 = vpop.f32.mrf.mxu1 }
 0x46f   : > { %3261 = vmatpush3.msra.mxu1 %v3244_v5  ;;  %1226 = vrot.lane.b32.xlu1 %v1221_v4, %s3676_s11  ;;  %s2736_s11 = sshll.u32 %s399_s21, 4  ;;  %s2737_s11 = int_to_ptr.vmem [resolvable:$true] %s2736_s11 }
 0x470   : > { %v1337_v6 = vpop.f32.mrf.mxu1  ;;  %3262 = vmatprep.subr.mxu1 %v3672_v0  ;;  %v3231_v7 = vpop.f32.mrf.mxu0  ;;  %s3582_s17 = scalar_lea.vmem %s2737_s11, 32  ;;  %p3589_p6 = scmp.lt.s32.totalorder %s2737_s11, %s3587_s30 }
 0x471   : > { %3263 = vmatpush3.msra.mxu1 %v1337_v6  ;;  %p3583_p0 = scmp.ne.s32.totalorder %s2737_s11, %s3582_s17 }
 0x472   : > { %3264 = vmatprep.subr.mxu1 %v3672_v0 }
 0x473   : > { %p3584_p2 = pnand %p3583_p0, %p3779_p9 }
 0x475   : > { %p3585_p5 = pneg %p3584_p2 }
 0x47b   : > { %v1412_v8 = vpop.f32.mrf.mxu0 }
 0x47c   : > { %v1413_v9 = vadd.f32 %v1412_v8, %v3911_v23 }
 0x47d   : > { %v3259_v10 = vpop.f32.mrf.mxu0 }
 0x47e   : > { %3514 = vtanh.f32 %v1413_v9 }
 0x47f   : > { %v3275_v11 = vpop.f32.mrf.mxu0 }
 0x481   : > { %v1579_v12 = vpop.f32.mrf.mxu0 }
 0x483   : > { %v3278_v14 = vpop.f32.mrf.mxu0 }
 0x485   : > { %v1589_v15 = vpop.f32.mrf.mxu0 }
 0x48b   : > { %v3515_v13 = vpop.eup %3514 }
 0x48c   : > { %3265 = vmatpush3.msra.mxu1 %v3515_v13  ;;  %3279 = vmatprep.mubr.msk.f32.mxu0 %vm410_vm0, %v3515_v13 }
 0x48d   : > { %3267 = vmatmul.mubr.msk.f32.vlgmr.msra.gmra.mxu1 %vm628_vm3, %v3917_v29  ;;  %3280 = vmatmul.mubr.msk.f32.gmra.mxu0 %vm410_vm0, %v1337_v6 }
 0x48e   : > { %3282 = vmatprep.subr.mxu1 %v3672_v0  ;;  %3294 = vmatprep.mubr.msk.f32.mxu1 %vm3673_vm1, %v3672_v0 }
 0x48f   : > { %3283 = vmatpush3.msra.mxu1 %v3278_v14  ;;  %3303 = vmatprep.mubr.msk.f32.mxu0 %vm3673_vm1, %v3672_v0 }
 0x490   : > { %3284 = vmatprep.subr.mxu1 %v3672_v0 }
 0x491   : > { %3285 = vmatpush3.msra.mxu1 %v1589_v15 }
 0x492   : > { %3286 = vmatprep.subr.mxu1 %v3672_v0 }
 0x493   : > { %3287 = vmatpush3.msra.mxu1 %v3515_v13 }
 0x494   : > { %3288 = vmatprep.subr.mxu1 %v3672_v0 }
 0x495   : > { %3289 = vmatpush3.msra.mxu1 %v3275_v11 }
 0x496   : > { %3290 = vmatprep.subr.mxu1 %v3672_v0 }
 0x497   : > { %3291 = vmatpush3.msra.mxu1 %v1579_v12 }
 0x498   : > { %3292 = vmatprep.subr.mxu1 %v3672_v0 }
 0x499   : > { %3293 = vmatpush3.msra.mxu1 %v2914_v16 }
 0x49a   : > { %3295 = vmatmul.mubr.msk.f32.vlgmr.msra.gmra.mxu1 %vm553_vm2, %v3897_v18  ;;  %3306 = vmatprep.subr.mxu1 %v2924_v17 }
 0x49b   : > { %3307 = vmatpush3.msra.mxu1 %v2924_v17  ;;  %3310 = vmatprep.mubr.msk.f32.mxu1 %vm410_vm0, %v2914_v16  ;;  %v423_v16 = vld [vmem:[%s4182_s7 + $0x10] sm:$0x3f] }
 0x49c   : > { %3308 = vmatprep.subr.mxu1 %v2923_v19 }
 0x49d   : > { %3309 = vmatpush3.msra.mxu1 %v2923_v19 }
 0x49e   : > { %3311 = vmatmul.mubr.msk.f32.vlgmr.msra.gmra.mxu1 %vm410_vm0, %v1579_v12  ;;  %3334 = vmatprep.subr.mxu1 %v3672_v0 }
 0x49f   : > { %3313 = vmatprep.mubr.msk.f32.mxu1 %vm410_vm0, %v3515_v13 }
 0x4a2   : > { %3314 = vmatmul.mubr.msk.f32.gmra.mxu1 %vm410_vm0, %v1589_v15 }
 0x4e1   : > { %v1227_v20 = vpop.permute.xlu1 %1226 }
 0x4e2   : > { %1230 = vst.msk [vmem:[#allocation4] sm:$0xf] %vm1229_vm6, %v1227_v20 }
 0x54d   : > { %v1483_v21 = vpop.f32.mrf.mxu1  ;;  %v3281_v22 = vpop.f32.mrf.mxu0 }
 0x54e   : > { %3298 = vmatpush3.msra.mxu0 %v3281_v22  ;;  %1488 = vrot.lane.b32.xlu1 %v1483_v21, %s3677_s0 }
 0x54f   : > { %v3268_v24 = vpop.f32.mrf.mxu1  ;;  %v1599_v25 = vpop.f32.mrf.mxu0  ;;  %3299 = vmatprep.subr.mxu0 %v3672_v0 }
 0x550   : > { %3300 = vmatpush3.msra.mxu0 %v1599_v25 }
 0x551   : > { %3301 = vmatprep.subr.mxu0 %v3672_v0 }
 0x55a   : > { %v1674_v26 = vpop.f32.mrf.mxu1 }
 0x55b   : > { %v1675_v27 = vadd.f32 %v1674_v26, %v3911_v23 }
 0x55c   : > { %v3296_v28 = vpop.f32.mrf.mxu1 }
 0x55d   : > { %3516 = vtanh.f32 %v1675_v27 }
 0x55e   : > { %v3312_v30 = vpop.f32.mrf.mxu1 }
 0x560   : > { %v1841_v31 = vpop.f32.mrf.mxu1 }
 0x562   : > { %v3315_v33 = vpop.f32.mrf.mxu1 }
 0x564   : > { %v1851_v34 = vpop.f32.mrf.mxu1 }
 0x56a   : > { %v3517_v32 = vpop.eup %3516 }
 0x56b   : > { %3302 = vmatpush3.msra.mxu0 %v3517_v32  ;;  %3316 = vmatprep.mubr.msk.f32.mxu1 %vm410_vm0, %v3517_v32 }
 0x56c   : > { %3304 = vmatmul.mubr.msk.f32.vlgmr.msra.gmra.mxu0 %vm628_vm3, %v3917_v29  ;;  %3317 = vmatmul.mubr.msk.f32.gmra.mxu1 %vm410_vm0, %v1599_v25 }
 0x56d   : > { %3319 = vmatprep.subr.mxu0 %v3672_v0  ;;  %3331 = vmatprep.mubr.msk.f32.mxu0 %vm3673_vm1, %v3672_v0 }
 0x56e   : > { %3320 = vmatpush3.msra.mxu0 %v3315_v33  ;;  %3340 = vmatprep.mubr.msk.f32.mxu1 %vm3673_vm1, %v3672_v0 }
 0x56f   : > { %3321 = vmatprep.subr.mxu0 %v3672_v0 }
 0x570   : > { %3322 = vmatpush3.msra.mxu0 %v1851_v34 }
 0x571   : > { %3323 = vmatprep.subr.mxu0 %v3672_v0 }
 0x572   : > { %3324 = vmatpush3.msra.mxu0 %v3517_v32 }
 0x573   : > { %3325 = vmatprep.subr.mxu0 %v3672_v0 }
 0x574   : > { %3326 = vmatpush3.msra.mxu0 %v3312_v30 }
 0x575   : > { %3327 = vmatprep.subr.mxu0 %v3672_v0 }
 0x576   : > { %3328 = vmatpush3.msra.mxu0 %v1841_v31 }
 0x577   : > { %3329 = vmatprep.subr.mxu0 %v3672_v0 }
 0x578   : > { %3330 = vmatpush3.msra.mxu0 %v2925_v35 }
 0x579   : > { %3332 = vmatmul.mubr.msk.f32.vlgmr.msra.gmra.mxu0 %vm553_vm2, %v3897_v18  ;;  %3343 = vmatprep.subr.mxu0 %v2935_v36 }
 0x57a   : > { %3344 = vmatpush3.msra.mxu0 %v2935_v36  ;;  %3347 = vmatprep.mubr.msk.f32.mxu0 %vm410_vm0, %v2925_v35 }
 0x57b   : > { %3345 = vmatprep.subr.mxu0 %v2934_v37 }
 0x57c   : > { %3346 = vmatpush3.msra.mxu0 %v2934_v37 }
 0x57d   : > { %3348 = vmatmul.mubr.msk.f32.vlgmr.msra.gmra.mxu0 %vm410_vm0, %v1841_v31  ;;  %3371 = vmatprep.subr.mxu0 %v3672_v0 }
 0x57e   : > { %3350 = vmatprep.mubr.msk.f32.mxu0 %vm410_vm0, %v3517_v32  ;;  %v2549_v32 = vld [vmem:[%s4181_s6] sm:$0x3] }
 0x581   : > { %3351 = vmatmul.mubr.msk.f32.gmra.mxu0 %vm410_vm0, %v1851_v34 }
 0x5c0   : > { %v1489_v38 = vpop.permute.xlu1 %1488 }
 0x5c1   : > { %1492 = vst.msk [vmem:[#allocation4] sm:$0xf] %vm1491_vm7, %v1489_v38 }
 0x62c   : > { %v1745_v39 = vpop.f32.mrf.mxu0  ;;  %v3318_v40 = vpop.f32.mrf.mxu1 }
 0x62d   : > { %3335 = vmatpush3.msra.mxu1 %v3318_v40  ;;  %1750 = vrot.lane.b32.xlu0 %v1745_v39, %s3678_s27 }
 0x62e   : > { %v1861_v41 = vpop.f32.mrf.mxu1  ;;  %3336 = vmatprep.subr.mxu1 %v3672_v0  ;;  %v3305_v42 = vpop.f32.mrf.mxu0 }
 0x62f   : > { %3337 = vmatpush3.msra.mxu1 %v1861_v41 }
 0x630   : > { %3338 = vmatprep.subr.mxu1 %v3672_v0 }
 0x639   : > { %v1936_v43 = vpop.f32.mrf.mxu0 }
 0x63a   : > { %v1937_v44 = vadd.f32 %v1936_v43, %v3911_v23 }
 0x63b   : > { %v3333_v45 = vpop.f32.mrf.mxu0 }
 0x63c   : > { %3518 = vtanh.f32 %v1937_v44 }
 0x63d   : > { %v3349_v46 = vpop.f32.mrf.mxu0 }
 0x63f   : > { %v2103_v47 = vpop.f32.mrf.mxu0 }
 0x641   : > { %v3352_v49 = vpop.f32.mrf.mxu0 }
 0x643   : > { %v2113_v50 = vpop.f32.mrf.mxu0 }
 0x649   : > { %v3519_v48 = vpop.eup %3518 }
 0x64a   : > { %3339 = vmatpush3.msra.mxu1 %v3519_v48  ;;  %3353 = vmatprep.mubr.msk.f32.mxu0 %vm410_vm0, %v3519_v48 }
 0x64b   : > { %3341 = vmatmul.mubr.msk.f32.vlgmr.msra.gmra.mxu1 %vm628_vm3, %v3917_v29  ;;  %3354 = vmatmul.mubr.msk.f32.gmra.mxu0 %vm410_vm0, %v1861_v41 }
 0x64c   : > { %3356 = vmatprep.subr.mxu1 %v3672_v0  ;;  %3368 = vmatprep.mubr.msk.f32.mxu1 %vm3673_vm1, %v3672_v0 }
 0x64d   : > { %3357 = vmatpush3.msra.mxu1 %v3352_v49  ;;  %3377 = vmatprep.mubr.msk.f32.mxu0 %vm3673_vm1, %v3672_v0 }
 0x64e   : > { %3358 = vmatprep.subr.mxu1 %v3672_v0 }
 0x64f   : > { %3359 = vmatpush3.msra.mxu1 %v2113_v50 }
 0x650   : > { %3360 = vmatprep.subr.mxu1 %v3672_v0 }
 0x651   : > { %3361 = vmatpush3.msra.mxu1 %v3519_v48 }
 0x652   : > { %3362 = vmatprep.subr.mxu1 %v3672_v0 }
 0x653   : > { %3363 = vmatpush3.msra.mxu1 %v3349_v46 }
 0x654   : > { %3364 = vmatprep.subr.mxu1 %v3672_v0 }
 0x655   : > { %3365 = vmatpush3.msra.mxu1 %v2103_v47 }
 0x656   : > { %3366 = vmatprep.subr.mxu1 %v3672_v0 }
 0x657   : > { %3367 = vmatpush3.msra.mxu1 %v2936_v51 }
 0x658   : > { %3369 = vmatmul.mubr.msk.f32.vlgmr.msra.gmra.mxu1 %vm553_vm2, %v3897_v18  ;;  %3380 = vmatprep.subr.mxu1 %v2946_v52 }
 0x659   : > { %3381 = vmatpush3.msra.mxu1 %v2946_v52  ;;  %3384 = vmatprep.mubr.msk.f32.mxu1 %vm410_vm0, %v2936_v51 }
 0x65a   : > { %3382 = vmatprep.subr.mxu1 %v2945_v53 }
 0x65b   : > { %3383 = vmatpush3.msra.mxu1 %v2945_v53 }
 0x65c   : > { %3385 = vmatmul.mubr.msk.f32.vlgmr.msra.gmra.mxu1 %vm410_vm0, %v2103_v47  ;;  %3408 = vmatprep.subr.mxu1 %v3672_v0 }
 0x65d   : > { %3387 = vmatprep.mubr.msk.f32.mxu1 %vm410_vm0, %v3519_v48 }
 0x660   : > { %3388 = vmatmul.mubr.msk.f32.gmra.mxu1 %vm410_vm0, %v2113_v50 }
 0x69f   : > { %v1751_v54 = vpop.permute.xlu0 %1750 }
 0x6a0   : > { %1754 = vst.msk [vmem:[#allocation4] sm:$0xf] %vm1753_vm8, %v1751_v54 }
 0x70b   : > { %v2007_v56 = vpop.f32.mrf.mxu1  ;;  %v3355_v57 = vpop.f32.mrf.mxu0 }
 0x70c   : > { %3372 = vmatpush3.msra.mxu0 %v3355_v57  ;;  %2012 = vrot.lane.b32.xlu1 %v2007_v56, %s3679_s29  ;;  %s4133_s29 = scalar_lea.hbm %s4183_s8, %s2960_s16 }
 0x70d   : > { %v3342_v58 = vpop.f32.mrf.mxu1  ;;  %v2123_v59 = vpop.f32.mrf.mxu0  ;;  %3373 = vmatprep.subr.mxu0 %v3672_v0 }
 0x70e   : > { %3374 = vmatpush3.msra.mxu0 %v2123_v59 }
 0x70f   : > { %3375 = vmatprep.subr.mxu0 %v3672_v0 }
 0x718   : > { %v2198_v60 = vpop.f32.mrf.mxu1 }
 0x719   : > { %v2199_v61 = vadd.f32 %v2198_v60, %v3911_v23 }
 0x71a   : > { %v3370_v62 = vpop.f32.mrf.mxu1 }
 0x71b   : > { %3520 = vtanh.f32 %v2199_v61 }
 0x71c   : > { %v3386_v63 = vpop.f32.mrf.mxu1 }
 0x71e   : > { %v2365_v1 = vpop.f32.mrf.mxu1 }
 0x71f   : > { %2542 = vst.msk [vmem:[#allocation2 + $0x8] sm:$0xff] %vm410_vm0, %v2365_v1 }
 0x720   : > { %v3389_v2 = vpop.f32.mrf.mxu1 }
 0x722   : > { %v2375_v3 = vpop.f32.mrf.mxu1 }
 0x723   : > { %2544 = vst.msk [vmem:[#allocation2 + $0x18] sm:$0xff] %vm410_vm0, %v2375_v3 }
 0x728   : > { %v3521_v4 = vpop.eup %3520 }
 0x729   : > { %2543 = vst.msk [vmem:[#allocation2 + $0x10] sm:$0xff] %vm410_vm0, %v3521_v4  ;;  %3376 = vmatpush3.msra.mxu0 %v3521_v4  ;;  %3390 = vmatprep.mubr.msk.f32.mxu1 %vm410_vm0, %v3521_v4 }
 0x72a   : > { %3378 = vmatmul.mubr.msk.f32.vlgmr.msra.gmra.mxu0 %vm628_vm3, %v3917_v29  ;;  %3391 = vmatmul.mubr.msk.f32.gmra.mxu1 %vm410_vm0, %v2123_v59 }
 0x72b   : > { %3393 = vmatprep.subr.mxu0 %v3672_v0  ;;  %3405 = vmatprep.mubr.msk.f32.mxu0 %vm3673_vm1, %v3672_v0 }
 0x72c   : > { %3394 = vmatpush3.msra.mxu0 %v3389_v2  ;;  %3414 = vmatprep.mubr.msk.f32.mxu1 %vm3673_vm1, %v3672_v0 }
 0x72d   : > { %3395 = vmatprep.subr.mxu0 %v3672_v0 }
 0x72e   : > { %3396 = vmatpush3.msra.mxu0 %v2375_v3 }
 0x72f   : > { %3397 = vmatprep.subr.mxu0 %v3672_v0 }
 0x730   : > { %3398 = vmatpush3.msra.mxu0 %v3521_v4 }
 0x731   : > { %3399 = vmatprep.subr.mxu0 %v3672_v0 }
 0x732   : > { %3400 = vmatpush3.msra.mxu0 %v3386_v63 }
 0x733   : > { %3401 = vmatprep.subr.mxu0 %v3672_v0 }
 0x734   : > { %3402 = vmatpush3.msra.mxu0 %v2365_v1 }
 0x735   : > { %3403 = vmatprep.subr.mxu0 %v3672_v0 }
 0x736   : > { %3404 = vmatpush3.msra.mxu0 %v2947_v55 }
 0x737   : > { %3406 = vmatmul.mubr.msk.f32.vlgmr.msra.gmra.mxu0 %vm553_vm2, %v3897_v18  ;;  %3417 = vmatprep.subr.mxu0 %v3672_v0  ;;  %v422_v18 = vld [vmem:[%s4182_s7 + $0x8] sm:$0xff] }
 0x738   : > { %3419 = vmatprep.mubr.msk.f32.mxu0 %vm3673_vm1, %v3672_v0 }
 0x77e   : > { %v2013_v5 = vpop.permute.xlu1 %2012 }
 0x77f   : > { %2016 = vst.msk [vmem:[#allocation4] sm:$0xf] %vm2015_vm9, %v2013_v5 }
 0x7ea   : > { %v2269_v6 = vpop.f32.mrf.mxu0  ;;  %v3392_v7 = vpop.f32.mrf.mxu1 }
 0x7eb   : > { %3409 = vmatpush3.msra.mxu1 %v3392_v7  ;;  %2274 = vrot.lane.b32.xlu0 %v2269_v6, %s3680_s22  ;;  %s2722_s22 = scalar_lea.sflag [#allocation7], %s3836_s19 }
 0x7ec   : > { %v3379_v8 = vpop.f32.mrf.mxu0  ;;  %v2385_v9 = vpop.f32.mrf.mxu1  ;;  %3410 = vmatprep.subr.mxu1 %v3672_v0 }
 0x7ed   : > { %2546 = vst.msk [vmem:[#allocation2 + $0x28] sm:$0xff] %vm410_vm0, %v2385_v9  ;;  %3411 = vmatpush3.msra.mxu1 %v2385_v9 }
 0x7ee   : > { %3412 = vmatprep.subr.mxu1 %v3672_v0 }
 0x7ef   : > { %2552 = vperm.xlu0 %3506, %v422_v18  }
 0x7f7   : > { %v2460_v10 = vpop.f32.mrf.mxu0 }
 0x7f8   : > { %v2461_v11 = vadd.f32 %v2460_v10, %v3911_v23 }
 0x7f9   : > { %v3407_v12 = vpop.f32.mrf.mxu0 }
 0x7fa   : > { %3522 = vtanh.f32 %v2461_v11 }
 0x807   : > { %v3523_v13 = vpop.eup %3522 }
 0x808   : > { %2545 = vst.msk [vmem:[#allocation2 + $0x20] sm:$0xff] %vm410_vm0, %v3523_v13  ;;  %2547 = vst.msk [vmem:[#allocation3] sm:$0xff] %vm410_vm0, %v3523_v13  ;;  %3413 = vmatpush3.msra.mxu1 %v3523_v13 }
 0x809   : > { %3415 = vmatmul.mubr.msk.f32.vlgmr.msra.gmra.mxu1 %vm628_vm3, %v3917_v29  ;;  %3422 = vmatprep.subr.mxu1 %v3672_v0 }
 0x80a   : > { %3424 = vmatprep.mubr.msk.f32.mxu1 %vm3673_vm1, %v3672_v0  ;;  %v2548_v0 = vld [vmem:[%s4180_s5] sm:$0xff] }
 0x85d   : > { %v2275_v14 = vpop.permute.xlu0 %2274 }
 0x85e   : > { %2278 = vst.msk [vmem:[#allocation4] sm:$0xf] %vm2277_vm10, %v2275_v14 }
 0x86a   : > { %v2553_v29 = vpop.permute.xlu0 %2552 }
 0x86b   : > { %v2563_v25 = vrot.slane %v2553_v29, 4 }
 0x8c9   : > { %v2531_v23 = vpop.f32.mrf.mxu1 }
 0x8ca   : > { %2536 = vrot.lane.b32.xlu1 %v2531_v23, %s3681_s14  ;;  %s3588_s14 = scalar_lea.vmem %s3587_s30, 64 }
 0x8cb   : > { %v3416_v15 = vpop.f32.mrf.mxu1  ;;  %p3590_p4 = scmp.lt.s32.totalorder %s3588_s14, %s3582_s17 }
 0x8cd   : > { %p3591_p7 = por %p3590_p4, %p3589_p6 }
 0x8ce   : > { %2557 = vperm.xlu1 %3507, %v423_v16  }
 0x8cf   : > { %p3592_p1 = pnand %p3591_p7, %p3585_p5 }
 0x93c   : > { %v2537_v17 = vpop.permute.xlu1 %2536 }
 0x93d   : > { %2540 = vst.msk [vmem:[#allocation4] sm:$0xf] %vm2539_vm11, %v2537_v17 }
 0x944   : > { %v2559_v19 = vld [vmem:[#allocation4] sm:$0xf] }
 0x945   : > { %v2560_v20 = vadd.f32 %v2559_v19, %v2553_v29 }
 0x947   : > { %3524 = vtanh.f32 %v2560_v20 }
 0x949   : > { %v2558_v22 = vpop.permute.xlu1 %2557 }
 0x94a   : > { %v2564_v24 = vrot.slane %v2558_v22, 4 }
 0x94c   : > { %v2565_v26 = vsel %vm2562_vm13, %v2563_v25, %v2564_v24 }
 0x954   : > { %v3525_v21 = vpop.eup %3524 }
 0x955   : > { %3418 = vmatpush3.msk.msra.mxu0 %vm2562_vm13, %v3525_v21 }
 0x956   : > { %3420 = vmatmul.mubr.msk.f32.vlgmr.msra.gmra.mxu0 %vm2567_vm12, %v2548_v0 }
 0xa16   : > { %v2640_v27 = vpop.f32.mrf.mxu0 }
 0xa17   : > { %v2641_v28 = vadd.f32 %v2640_v27, %v2565_v26 }
 0xa18   : > { %v3421_v30 = vpop.f32.mrf.mxu0 }
 0xa19   : > { %v2644_v31 = vmax.f32 %v2641_v28, 0.0 }
 0xa1b   : > { %3423 = vmatpush3.msra.mxu1 %v2644_v31 }
 0xa1c   : > { %3425 = vmatmul.mubr.msk.f32.vlgmr.msra.gmra.mxu1 %vm2646_vm14, %v2549_v32 }
 0xadc   : > { %v2716_v33 = vpop.f32.mrf.mxu1 }
 0xadd   : > { %v2717_v34 = vadd.f32 %v2716_v33, %v2564_v24 }
 0xade   : > { %v3426_v35 = vpop.f32.mrf.mxu1 }
 0xadf   : > { %2720 = vst [vmem:[%s399_s21] sm:$0x3] %v2717_v34 }
 0xae0   : > { %3595 = shalt.err (!%p3592_p1)
}
 0xae1   : > { %s3596_s24 = scalar_lea.hbm %s4133_s29, 32  ;;  %s3600_s13 = scalar_lea.hbm %s4183_s8, 64 }
 0xae2   : > { %p3597_p10 = scmp.ne.s32.totalorder %s4133_s29, %s3596_s24  ;;  %p3601_p8 = scmp.lt.s32.totalorder %s4133_s29, %s4183_s8 }
 0xae3   : > { %p3602_p0 = scmp.lt.s32.totalorder %s3600_s13, %s3596_s24 }
 0xae4   : > { %p3598_p13 = pnand %p3597_p10, %p3779_p9 }
 0xae5   : > { %p3603_p2 = por %p3602_p0, %p3601_p8 }
 0xae6   : > { %p3599_p3 = pneg %p3598_p13 }
 0xae8   : > { %p3604_p5 = pnand %p3603_p2, %p3599_p3 }
 0xaea   : > { %3607 = shalt.err (!%p3604_p5)
}
 0xaeb   : > { %3431 = dma.vmem_to_hbm [thread:$0]  (%p3779_p9), %s2737_s11, 32, %s4133_s29, %s2722_s22  }
 0xaec PF: > { %s4201_s26 = sld [smem:[#allocation14_spill]]  ;;  %p3441_p6 = pnand %p2859_p12, %p3786_p11 }
 0xaee   : > { %p3442_p4 = pneg %p3441_p6 }
 0xaf2   : > { %s2748_s16 = sand.u32 1, %s4201_s26  }
 0xaf3   : > { %s2749_s21 = scalar_lea.sflag [#allocation7], %s2748_s16 }
 0xaf4   : > { %3641 = dma.done.wait (%p3442_p4), %s2749_s21, 32  }
 0xaf5   : > { %3643 = vsyncadd (%p3442_p4), %s2749_s21, 4294967264  ;;  %s27_s10 = sadd.s32 1, %s3666_s10   ;;  %s4203_s0 = sld [smem:[#allocation15_spill]] }
 0xaf6   : > { %p24_p7 = scmp.ge.s32.totalorder %s27_s10, 4   ;;  %s4204_s29 = sld [smem:[#allocation17_spill]] }
 0xaf7   : > { %s4205_s18 = sld [smem:[#allocation16_spill]]  ;;  %s4206_s27 = smov %s3650_s28 }
 0xaf8   : > { %s4208_s30 = smov %s3662_s9 }
 0xaf9   :  { %26 = sbr.rel (!%p24_p7) target bundleno = 10 (0xa), region = 131 }
 0xafb   : > { %s4207_s28 = smov %s4203_s0 }
 0xafd   : > { %s4209_s9 = smov %s4205_s18 }
 0xafe   :  { %2754 = vsyncpa [#allocation6], 1 }
 0xaff   :  { %2756 = vsyncpa [#allocation6 + $0x1], 1 }
 0xb00   :  { %2757 = vsyncpa [#allocation9], 1 }
 0xb01   :  { %2759 = vsyncpa [#allocation9 + $0x1], 1 }
 0xb02   :  { %2760 = vsyncpa [#allocation7], 1 }
 0xb03   :  { %2762 = vsyncpa [#allocation7 + $0x1], 1 }

</bundles_post_ra>
